<compile_context>
chip_gen: v6e
topology: v6e:2x2x1
jax: 0.10.0
libtpu: 0.0.40
codegen_flags: <defaults>
</compile_context>

<pallas_src>
import jax
import jax.numpy as jnp
import numpy as np
from jax.experimental import pallas as pl
from jax.experimental.pallas import tpu as pltpu


# Hyperparameters (small shapes consistent with the module).
EMBEDDING_DIM = 32
HIDDEN_DIM = 32
VOCAB_SIZE = 50
VOCAB_PAD = 64          # vocab padded for a clean one-hot contraction dim
NCLASSES = 4
BATCH = 2
SEQ = 8
LANE = 128              # lane-padded width of the classifier-head output
STEP_ROWS = 8           # batch rows padded to a full sublane group per step


def lstm_classifier_kernel(ids_ref,      # (T*8, 1)      int32 VMEM  reverse-time ids
                           embproj_ref,  # (4, VPAD, H)  f32   VMEM  emb@W_ih^T+bias, per gate
                           whh_ref,      # (4, H, H)     f32   VMEM  W_hh^T, per gate
                           wlin_ref,     # (H, LANE)     f32   VMEM  zero-padded head
                           blin_ref,     # (1, LANE)     f32   VMEM  zero-padded head bias
                           logits_ref):  # (8, LANE)     f32   VMEM  out
    rows = ids_ref.shape[0]              # T * STEP_ROWS
    vpad = embproj_ref.shape[1]
    H = whh_ref.shape[-1]
    T = rows // STEP_ROWS

    # ---- Fused embedding gather + input projection: one-hot matmul. --------
    # Rows are reverse-time-major, 8 rows per step (rows b>=B are padding).
    ids = ids_ref[...]                                            # (rows, 1)
    iota = jax.lax.broadcasted_iota(jnp.int32, (rows, vpad), 1)
    onehot = (iota == ids).astype(jnp.float32)                    # (rows, VPAD)
    # Per-gate gx (bias already folded into embproj); off the serial chain.
    gx = [jnp.dot(onehot, embproj_ref[k],
                  preferred_element_type=jnp.float32)             # (rows, H)
          for k in range(4)]
    w = [whh_ref[k] for k in range(4)]                            # 4 x (H, H)

    # ---- Reverse-direction LSTM recurrence, fully unrolled (T static). -----
    # Gate order follows PyTorch: k = 0:i, 1:f, 2:g, 3:o.  Per-gate tensors
    # are all (8, H) at lane/sublane offset 0 -> zero relayouts on the chain.
    h = jnp.zeros((STEP_ROWS, H), jnp.float32)
    c = jnp.zeros((STEP_ROWS, H), jnp.float32)
    for s in range(T):
        lo = s * STEP_ROWS                                        # static, %8 == 0
        pre = [gx[k][lo:lo + STEP_ROWS, :]
               + jnp.dot(h, w[k], preferred_element_type=jnp.float32)
               for k in range(4)]
        i_g = jax.nn.sigmoid(pre[0])
        f_g = jax.nn.sigmoid(pre[1])
        g_g = jnp.tanh(pre[2])
        o_g = jax.nn.sigmoid(pre[3])
        c = f_g * c + i_g * g_g
        h = o_g * jnp.tanh(c)

    # ---- Classifier head on ht[-1]; full (8,128) lane-dense store. ---------
    logits_ref[...] = (jnp.dot(h, wlin_ref[...],
                               preferred_element_type=jnp.float32)
                       + blin_ref[...])


def prepare_params(params):
    """One-time parameter preprocessing (keep OUT of the per-call path)."""
    H = HIDDEN_DIM
    w_ih = params["w_ih_rev"]                                     # (4H, E)
    w_hh = params["w_hh_rev"]                                     # (4H, H)
    bias = params["b_ih_rev"] + params["b_hh_rev"]                # (4H,)

    emb_pad = jnp.zeros((VOCAB_PAD, EMBEDDING_DIM), jnp.float32)
    emb_pad = emb_pad.at[:VOCAB_SIZE].set(params["emb_table"])

    # Fold W_ih and both biases into the table; split the 4H axis per gate so
    # the kernel never lane-slices:  emb_proj[k] : (VPAD, H).
    proj = emb_pad @ w_ih.T + bias[None, :]                       # (VPAD, 4H)
    emb_proj = jnp.stack([proj[:, k * H:(k + 1) * H] for k in range(4)])
    whh4 = jnp.stack([w_hh[k * H:(k + 1) * H, :].T for k in range(4)])

    # Classifier head zero-padded to 128 output lanes (unmasked vst).
    wlin_pad = jnp.zeros((H, LANE), jnp.float32).at[:, :NCLASSES].set(
        params["w_lin"].T)
    blin_pad = jnp.zeros((1, LANE), jnp.float32).at[:, :NCLASSES].set(
        params["b_lin"][None, :])

    return {"emb_proj": emb_proj, "whh4": whh4,
            "wlin": wlin_pad, "blin": blin_pad}


def lstm_classifier_forward(sentence, prepped):
    """Per-call forward: only the id-column build + one pallas_call."""
    B, T = sentence.shape

    # Reverse-time, transpose to (T, B), pad batch rows to 8, flatten to a
    # (T*8, 1) column the kernel compares against an in-kernel iota.
    ids_rt = jnp.flip(sentence.astype(jnp.int32), axis=1).T       # (T, B)
    ids_pad = jnp.pad(ids_rt, ((0, 0), (0, STEP_ROWS - B)))       # (T, 8)
    ids_col = ids_pad.reshape(T * STEP_ROWS, 1)

    vmem = pl.BlockSpec(memory_space=pltpu.MemorySpace.VMEM)

    # Single fused kernel; total working set < 100 KB, so no grid/pipelining
    # is needed on any TPU generation (v7x's 64 MiB VMEM is a non-issue).
    # TODO(synk): if batch ever grows, add a batch grid axis with
    # dimension_semantics=("parallel",) to engage both v7x TensorCores.
    logits_pad = pl.pallas_call(
        lstm_classifier_kernel,
        out_shape=jax.ShapeDtypeStruct((STEP_ROWS, LANE), jnp.float32),
        in_specs=[vmem] * 5,
        out_specs=vmem,
    )(ids_col, prepped["emb_proj"], prepped["whh4"],
      prepped["wlin"], prepped["blin"])
    return logits_pad[:B, :NCLASSES]


def init_params(key):
    """Deterministic synthetic parameters (shapes match nn.Module __init__)."""
    ks = jax.random.split(key, 7)
    s = 1.0 / np.sqrt(HIDDEN_DIM)
    u = lambda k, shape: jax.random.uniform(k, shape, jnp.float32, -s, s)
    return {
        "emb_table": jax.random.normal(
            ks[0], (VOCAB_SIZE, EMBEDDING_DIM), jnp.float32),
        # Reverse-direction LSTM weights (torch: weight_ih_l0_reverse, ...)
        "w_ih_rev": u(ks[1], (4 * HIDDEN_DIM, EMBEDDING_DIM)),
        "w_hh_rev": u(ks[2], (4 * HIDDEN_DIM, HIDDEN_DIM)),
        "b_ih_rev": u(ks[3], (4 * HIDDEN_DIM,)),
        "b_hh_rev": u(ks[4], (4 * HIDDEN_DIM,)),
        # TODO(synk): forward-direction LSTM weights omitted — for a 1-layer
        # bidirectional LSTM, ht[-1] (the only state consumed by the head)
        # depends solely on the reverse direction, and lstm_out is discarded.
        "w_lin": u(ks[5], (NCLASSES, HIDDEN_DIM)),
        "b_lin": u(ks[6], (NCLASSES,)),
    }


def reference_forward(sentence, params):
    """Pure-JAX reference for the same forward pass (uses raw params)."""
    H = HIDDEN_DIM
    emb = params["emb_table"][sentence]                 # (B, T, E)

    def cell(carry, x_t):
        h, c = carry
        gates = (x_t @ params["w_ih_rev"].T + params["b_ih_rev"]
                 + h @ params["w_hh_rev"].T + params["b_hh_rev"])
        i_g = jax.nn.sigmoid(gates[:, 0 * H:1 * H])
        f_g = jax.nn.sigmoid(gates[:, 1 * H:2 * H])
        g_g = jnp.tanh(gates[:, 2 * H:3 * H])
        o_g = jax.nn.sigmoid(gates[:, 3 * H:4 * H])
        c = f_g * c + i_g * g_g
        h = o_g * jnp.tanh(c)
        return (h, c), None

    h0 = jnp.zeros((sentence.shape[0], H), jnp.float32)
    (h_fin, _), _ = jax.lax.scan(
        cell, (h0, h0), jnp.transpose(emb, (1, 0, 2)), reverse=True)
    return h_fin @ params["w_lin"].T + params["b_lin"]


if __name__ == "__main__":
    key = jax.random.PRNGKey(0)
    k_sent, k_param = jax.random.split(key)
    sentence = jax.random.randint(
        k_sent, (BATCH, SEQ), 0, VOCAB_SIZE, dtype=jnp.int32)
    params = init_params(k_param)

    # One-time prep (transposes, bias fold, gate split, lane padding) —
    # deliberately outside the jitted per-call forward.
    prepped = prepare_params(params)
    prepped = jax.tree_util.tree_map(jax.block_until_ready, prepped)

    fwd = jax.jit(lstm_classifier_forward)
    logits = fwd(sentence, prepped)
    jax.block_until_ready(logits)

    ref = reference_forward(sentence, params)
    assert logits.shape == (BATCH, NCLASSES)
    # All-f32 paths keep this comfortably; slack only covers MXU f32
    # pass-count differences vs the XLA reference dots.
    np.testing.assert_allclose(
        np.asarray(logits), np.asarray(ref), atol=5e-3, rtol=5e-3)
    print("KERNEL_OK")
</pallas_src>

<mosaic_0001>
module attributes {stable_mosaic.version = 11 : i64} {
  func.func @lstm_classifier_kernel(%arg0: memref<64x1xi32, #tpu.memory_space<vmem>>, %arg1: memref<4x64x32xf32, #tpu.memory_space<vmem>>, %arg2: memref<4x32x32xf32, #tpu.memory_space<vmem>>, %arg3: memref<32x128xf32, #tpu.memory_space<vmem>>, %arg4: memref<1x128xf32, #tpu.memory_space<vmem>>, %arg5: memref<8x128xf32, #tpu.memory_space<vmem>>) attributes {dimension_semantics = [], scalar_prefetch = 0 : i64, scratch_operands = 0 : i64, tpu.core_type = #tpu.core_type<tc>} {
    %c0 = arith.constant 0 : index
    %c0_0 = arith.constant 0 : index
    %0 = vector.load %arg0[%c0, %c0_0] : memref<64x1xi32, #tpu.memory_space<vmem>>, vector<64x1xi32>
    %1 = tpu.iota {dimensions = array<i32: 1>} : vector<64x64xi32>
    %2 = vector.broadcast %0 : vector<64x1xi32> to vector<64x64xi32>
    %3 = arith.cmpi eq, %1, %2 : vector<64x64xi32>
    %4 = arith.extui %3 : vector<64x64xi1> to vector<64x64xi32>
    %5 = arith.sitofp %4 : vector<64x64xi32> to vector<64x64xf32>
    %c0_1 = arith.constant 0 : index
    %c0_2 = arith.constant 0 : index
    %c0_3 = arith.constant 0 : index
    %6 = vector.load %arg1[%c0_1, %c0_2, %c0_3] : memref<4x64x32xf32, #tpu.memory_space<vmem>>, vector<1x64x32xf32>
    %7 = vector.shape_cast %6 : vector<1x64x32xf32> to vector<64x32xf32>
    %cst = arith.constant dense<0.000000e+00> : vector<64x32xf32>
    %8 = tpu.matmul %5, %7, %cst {dimension_numbers = #tpu.dot_dimension_numbers<[1], [0], [0], [1], [0, 0, 1, 1], [], []>} : vector<64x64xf32>, vector<64x32xf32>, vector<64x32xf32> -> vector<64x32xf32>
    %c1 = arith.constant 1 : index
    %c0_4 = arith.constant 0 : index
    %c0_5 = arith.constant 0 : index
    %9 = vector.load %arg1[%c1, %c0_4, %c0_5] : memref<4x64x32xf32, #tpu.memory_space<vmem>>, vector<1x64x32xf32>
    %10 = vector.shape_cast %9 : vector<1x64x32xf32> to vector<64x32xf32>
    %cst_6 = arith.constant dense<0.000000e+00> : vector<64x32xf32>
    %11 = tpu.matmul %5, %10, %cst_6 {dimension_numbers = #tpu.dot_dimension_numbers<[1], [0], [0], [1], [0, 0, 1, 1], [], []>} : vector<64x64xf32>, vector<64x32xf32>, vector<64x32xf32> -> vector<64x32xf32>
    %c2 = arith.constant 2 : index
    %c0_7 = arith.constant 0 : index
    %c0_8 = arith.constant 0 : index
    %12 = vector.load %arg1[%c2, %c0_7, %c0_8] : memref<4x64x32xf32, #tpu.memory_space<vmem>>, vector<1x64x32xf32>
    %13 = vector.shape_cast %12 : vector<1x64x32xf32> to vector<64x32xf32>
    %cst_9 = arith.constant dense<0.000000e+00> : vector<64x32xf32>
    %14 = tpu.matmul %5, %13, %cst_9 {dimension_numbers = #tpu.dot_dimension_numbers<[1], [0], [0], [1], [0, 0, 1, 1], [], []>} : vector<64x64xf32>, vector<64x32xf32>, vector<64x32xf32> -> vector<64x32xf32>
    %c3 = arith.constant 3 : index
    %c0_10 = arith.constant 0 : index
    %c0_11 = arith.constant 0 : index
    %15 = vector.load %arg1[%c3, %c0_10, %c0_11] : memref<4x64x32xf32, #tpu.memory_space<vmem>>, vector<1x64x32xf32>
    %16 = vector.shape_cast %15 : vector<1x64x32xf32> to vector<64x32xf32>
    %cst_12 = arith.constant dense<0.000000e+00> : vector<64x32xf32>
    %17 = tpu.matmul %5, %16, %cst_12 {dimension_numbers = #tpu.dot_dimension_numbers<[1], [0], [0], [1], [0, 0, 1, 1], [], []>} : vector<64x64xf32>, vector<64x32xf32>, vector<64x32xf32> -> vector<64x32xf32>
    %c0_13 = arith.constant 0 : index
    %c0_14 = arith.constant 0 : index
    %c0_15 = arith.constant 0 : index
    %18 = vector.load %arg2[%c0_13, %c0_14, %c0_15] : memref<4x32x32xf32, #tpu.memory_space<vmem>>, vector<1x32x32xf32>
    %19 = vector.shape_cast %18 : vector<1x32x32xf32> to vector<32x32xf32>
    %c1_16 = arith.constant 1 : index
    %c0_17 = arith.constant 0 : index
    %c0_18 = arith.constant 0 : index
    %20 = vector.load %arg2[%c1_16, %c0_17, %c0_18] : memref<4x32x32xf32, #tpu.memory_space<vmem>>, vector<1x32x32xf32>
    %21 = vector.shape_cast %20 : vector<1x32x32xf32> to vector<32x32xf32>
    %c2_19 = arith.constant 2 : index
    %c0_20 = arith.constant 0 : index
    %c0_21 = arith.constant 0 : index
    %22 = vector.load %arg2[%c2_19, %c0_20, %c0_21] : memref<4x32x32xf32, #tpu.memory_space<vmem>>, vector<1x32x32xf32>
    %23 = vector.shape_cast %22 : vector<1x32x32xf32> to vector<32x32xf32>
    %c3_22 = arith.constant 3 : index
    %c0_23 = arith.constant 0 : index
    %c0_24 = arith.constant 0 : index
    %24 = vector.load %arg2[%c3_22, %c0_23, %c0_24] : memref<4x32x32xf32, #tpu.memory_space<vmem>>, vector<1x32x32xf32>
    %25 = vector.shape_cast %24 : vector<1x32x32xf32> to vector<32x32xf32>
    %cst_25 = arith.constant 0.000000e+00 : f32
    %26 = vector.broadcast %cst_25 : f32 to vector<8x32xf32>
    %cst_26 = arith.constant 0.000000e+00 : f32
    %27 = vector.broadcast %cst_26 : f32 to vector<8x32xf32>
    %28 = vector.extract_strided_slice %8 {offsets = [0, 0], sizes = [8, 32], strides = [1, 1]} : vector<64x32xf32> to vector<8x32xf32>
    %cst_27 = arith.constant dense<0.000000e+00> : vector<8x32xf32>
    %29 = tpu.matmul %26, %19, %cst_27 {dimension_numbers = #tpu.dot_dimension_numbers<[1], [0], [0], [1], [0, 0, 1, 1], [], []>} : vector<8x32xf32>, vector<32x32xf32>, vector<8x32xf32> -> vector<8x32xf32>
    %30 = arith.addf %28, %29 : vector<8x32xf32>
    %31 = vector.extract_strided_slice %11 {offsets = [0, 0], sizes = [8, 32], strides = [1, 1]} : vector<64x32xf32> to vector<8x32xf32>
    %cst_28 = arith.constant dense<0.000000e+00> : vector<8x32xf32>
    %32 = tpu.matmul %26, %21, %cst_28 {dimension_numbers = #tpu.dot_dimension_numbers<[1], [0], [0], [1], [0, 0, 1, 1], [], []>} : vector<8x32xf32>, vector<32x32xf32>, vector<8x32xf32> -> vector<8x32xf32>
    %33 = arith.addf %31, %32 : vector<8x32xf32>
    %34 = vector.extract_strided_slice %14 {offsets = [0, 0], sizes = [8, 32], strides = [1, 1]} : vector<64x32xf32> to vector<8x32xf32>
    %cst_29 = arith.constant dense<0.000000e+00> : vector<8x32xf32>
    %35 = tpu.matmul %26, %23, %cst_29 {dimension_numbers = #tpu.dot_dimension_numbers<[1], [0], [0], [1], [0, 0, 1, 1], [], []>} : vector<8x32xf32>, vector<32x32xf32>, vector<8x32xf32> -> vector<8x32xf32>
    %36 = arith.addf %34, %35 : vector<8x32xf32>
    %37 = vector.extract_strided_slice %17 {offsets = [0, 0], sizes = [8, 32], strides = [1, 1]} : vector<64x32xf32> to vector<8x32xf32>
    %cst_30 = arith.constant dense<0.000000e+00> : vector<8x32xf32>
    %38 = tpu.matmul %26, %25, %cst_30 {dimension_numbers = #tpu.dot_dimension_numbers<[1], [0], [0], [1], [0, 0, 1, 1], [], []>} : vector<8x32xf32>, vector<32x32xf32>, vector<8x32xf32> -> vector<8x32xf32>
    %39 = arith.addf %37, %38 : vector<8x32xf32>
    %40 = arith.negf %30 : vector<8x32xf32>
    %41 = math.exp %40 : vector<8x32xf32>
    %cst_31 = arith.constant 1.000000e+00 : f32
    %42 = vector.broadcast %cst_31 : f32 to vector<8x32xf32>
    %43 = arith.addf %42, %41 : vector<8x32xf32>
    %44 = arith.divf %42, %43 : vector<8x32xf32>
    %45 = arith.negf %33 : vector<8x32xf32>
    %46 = math.exp %45 : vector<8x32xf32>
    %cst_32 = arith.constant 1.000000e+00 : f32
    %47 = vector.broadcast %cst_32 : f32 to vector<8x32xf32>
    %48 = arith.addf %47, %46 : vector<8x32xf32>
    %49 = arith.divf %47, %48 : vector<8x32xf32>
    %50 = math.tanh %36 : vector<8x32xf32>
    %51 = arith.negf %39 : vector<8x32xf32>
    %52 = math.exp %51 : vector<8x32xf32>
    %cst_33 = arith.constant 1.000000e+00 : f32
    %53 = vector.broadcast %cst_33 : f32 to vector<8x32xf32>
    %54 = arith.addf %53, %52 : vector<8x32xf32>
    %55 = arith.divf %53, %54 : vector<8x32xf32>
    %56 = arith.mulf %49, %27 : vector<8x32xf32>
    %57 = arith.mulf %44, %50 : vector<8x32xf32>
    %58 = arith.addf %56, %57 : vector<8x32xf32>
    %59 = math.tanh %58 : vector<8x32xf32>
    %60 = arith.mulf %55, %59 : vector<8x32xf32>
    %61 = vector.extract_strided_slice %8 {offsets = [8, 0], sizes = [8, 32], strides = [1, 1]} : vector<64x32xf32> to vector<8x32xf32>
    %cst_34 = arith.constant dense<0.000000e+00> : vector<8x32xf32>
    %62 = tpu.matmul %60, %19, %cst_34 {dimension_numbers = #tpu.dot_dimension_numbers<[1], [0], [0], [1], [0, 0, 1, 1], [], []>} : vector<8x32xf32>, vector<32x32xf32>, vector<8x32xf32> -> vector<8x32xf32>
    %63 = arith.addf %61, %62 : vector<8x32xf32>
    %64 = vector.extract_strided_slice %11 {offsets = [8, 0], sizes = [8, 32], strides = [1, 1]} : vector<64x32xf32> to vector<8x32xf32>
    %cst_35 = arith.constant dense<0.000000e+00> : vector<8x32xf32>
    %65 = tpu.matmul %60, %21, %cst_35 {dimension_numbers = #tpu.dot_dimension_numbers<[1], [0], [0], [1], [0, 0, 1, 1], [], []>} : vector<8x32xf32>, vector<32x32xf32>, vector<8x32xf32> -> vector<8x32xf32>
    %66 = arith.addf %64, %65 : vector<8x32xf32>
    %67 = vector.extract_strided_slice %14 {offsets = [8, 0], sizes = [8, 32], strides = [1, 1]} : vector<64x32xf32> to vector<8x32xf32>
    %cst_36 = arith.constant dense<0.000000e+00> : vector<8x32xf32>
    %68 = tpu.matmul %60, %23, %cst_36 {dimension_numbers = #tpu.dot_dimension_numbers<[1], [0], [0], [1], [0, 0, 1, 1], [], []>} : vector<8x32xf32>, vector<32x32xf32>, vector<8x32xf32> -> vector<8x32xf32>
    %69 = arith.addf %67, %68 : vector<8x32xf32>
    %70 = vector.extract_strided_slice %17 {offsets = [8, 0], sizes = [8, 32], strides = [1, 1]} : vector<64x32xf32> to vector<8x32xf32>
    %cst_37 = arith.constant dense<0.000000e+00> : vector<8x32xf32>
    %71 = tpu.matmul %60, %25, %cst_37 {dimension_numbers = #tpu.dot_dimension_numbers<[1], [0], [0], [1], [0, 0, 1, 1], [], []>} : vector<8x32xf32>, vector<32x32xf32>, vector<8x32xf32> -> vector<8x32xf32>
    %72 = arith.addf %70, %71 : vector<8x32xf32>
    %73 = arith.negf %63 : vector<8x32xf32>
    %74 = math.exp %73 : vector<8x32xf32>
    %cst_38 = arith.constant 1.000000e+00 : f32
    %75 = vector.broadcast %cst_38 : f32 to vector<8x32xf32>
    %76 = arith.addf %75, %74 : vector<8x32xf32>
    %77 = arith.divf %75, %76 : vector<8x32xf32>
    %78 = arith.negf %66 : vector<8x32xf32>
    %79 = math.exp %78 : vector<8x32xf32>
    %cst_39 = arith.constant 1.000000e+00 : f32
    %80 = vector.broadcast %cst_39 : f32 to vector<8x32xf32>
    %81 = arith.addf %80, %79 : vector<8x32xf32>
    %82 = arith.divf %80, %81 : vector<8x32xf32>
    %83 = math.tanh %69 : vector<8x32xf32>
    %84 = arith.negf %72 : vector<8x32xf32>
    %85 = math.exp %84 : vector<8x32xf32>
    %cst_40 = arith.constant 1.000000e+00 : f32
    %86 = vector.broadcast %cst_40 : f32 to vector<8x32xf32>
    %87 = arith.addf %86, %85 : vector<8x32xf32>
    %88 = arith.divf %86, %87 : vector<8x32xf32>
    %89 = arith.mulf %82, %58 : vector<8x32xf32>
    %90 = arith.mulf %77, %83 : vector<8x32xf32>
    %91 = arith.addf %89, %90 : vector<8x32xf32>
    %92 = math.tanh %91 : vector<8x32xf32>
    %93 = arith.mulf %88, %92 : vector<8x32xf32>
    %94 = vector.extract_strided_slice %8 {offsets = [16, 0], sizes = [8, 32], strides = [1, 1]} : vector<64x32xf32> to vector<8x32xf32>
    %cst_41 = arith.constant dense<0.000000e+00> : vector<8x32xf32>
    %95 = tpu.matmul %93, %19, %cst_41 {dimension_numbers = #tpu.dot_dimension_numbers<[1], [0], [0], [1], [0, 0, 1, 1], [], []>} : vector<8x32xf32>, vector<32x32xf32>, vector<8x32xf32> -> vector<8x32xf32>
    %96 = arith.addf %94, %95 : vector<8x32xf32>
    %97 = vector.extract_strided_slice %11 {offsets = [16, 0], sizes = [8, 32], strides = [1, 1]} : vector<64x32xf32> to vector<8x32xf32>
    %cst_42 = arith.constant dense<0.000000e+00> : vector<8x32xf32>
    %98 = tpu.matmul %93, %21, %cst_42 {dimension_numbers = #tpu.dot_dimension_numbers<[1], [0], [0], [1], [0, 0, 1, 1], [], []>} : vector<8x32xf32>, vector<32x32xf32>, vector<8x32xf32> -> vector<8x32xf32>
    %99 = arith.addf %97, %98 : vector<8x32xf32>
    %100 = vector.extract_strided_slice %14 {offsets = [16, 0], sizes = [8, 32], strides = [1, 1]} : vector<64x32xf32> to vector<8x32xf32>
    %cst_43 = arith.constant dense<0.000000e+00> : vector<8x32xf32>
    %101 = tpu.matmul %93, %23, %cst_43 {dimension_numbers = #tpu.dot_dimension_numbers<[1], [0], [0], [1], [0, 0, 1, 1], [], []>} : vector<8x32xf32>, vector<32x32xf32>, vector<8x32xf32> -> vector<8x32xf32>
    %102 = arith.addf %100, %101 : vector<8x32xf32>
    %103 = vector.extract_strided_slice %17 {offsets = [16, 0], sizes = [8, 32], strides = [1, 1]} : vector<64x32xf32> to vector<8x32xf32>
    %cst_44 = arith.constant dense<0.000000e+00> : vector<8x32xf32>
    %104 = tpu.matmul %93, %25, %cst_44 {dimension_numbers = #tpu.dot_dimension_numbers<[1], [0], [0], [1], [0, 0, 1, 1], [], []>} : vector<8x32xf32>, vector<32x32xf32>, vector<8x32xf32> -> vector<8x32xf32>
    %105 = arith.addf %103, %104 : vector<8x32xf32>
    %106 = arith.negf %96 : vector<8x32xf32>
    %107 = math.exp %106 : vector<8x32xf32>
    %cst_45 = arith.constant 1.000000e+00 : f32
    %108 = vector.broadcast %cst_45 : f32 to vector<8x32xf32>
    %109 = arith.addf %108, %107 : vector<8x32xf32>
    %110 = arith.divf %108, %109 : vector<8x32xf32>
    %111 = arith.negf %99 : vector<8x32xf32>
    %112 = math.exp %111 : vector<8x32xf32>
    %cst_46 = arith.constant 1.000000e+00 : f32
    %113 = vector.broadcast %cst_46 : f32 to vector<8x32xf32>
    %114 = arith.addf %113, %112 : vector<8x32xf32>
    %115 = arith.divf %113, %114 : vector<8x32xf32>
    %116 = math.tanh %102 : vector<8x32xf32>
    %117 = arith.negf %105 : vector<8x32xf32>
    %118 = math.exp %117 : vector<8x32xf32>
    %cst_47 = arith.constant 1.000000e+00 : f32
    %119 = vector.broadcast %cst_47 : f32 to vector<8x32xf32>
    %120 = arith.addf %119, %118 : vector<8x32xf32>
    %121 = arith.divf %119, %120 : vector<8x32xf32>
    %122 = arith.mulf %115, %91 : vector<8x32xf32>
    %123 = arith.mulf %110, %116 : vector<8x32xf32>
    %124 = arith.addf %122, %123 : vector<8x32xf32>
    %125 = math.tanh %124 : vector<8x32xf32>
    %126 = arith.mulf %121, %125 : vector<8x32xf32>
    %127 = vector.extract_strided_slice %8 {offsets = [24, 0], sizes = [8, 32], strides = [1, 1]} : vector<64x32xf32> to vector<8x32xf32>
    %cst_48 = arith.constant dense<0.000000e+00> : vector<8x32xf32>
    %128 = tpu.matmul %126, %19, %cst_48 {dimension_numbers = #tpu.dot_dimension_numbers<[1], [0], [0], [1], [0, 0, 1, 1], [], []>} : vector<8x32xf32>, vector<32x32xf32>, vector<8x32xf32> -> vector<8x32xf32>
    %129 = arith.addf %127, %128 : vector<8x32xf32>
    %130 = vector.extract_strided_slice %11 {offsets = [24, 0], sizes = [8, 32], strides = [1, 1]} : vector<64x32xf32> to vector<8x32xf32>
    %cst_49 = arith.constant dense<0.000000e+00> : vector<8x32xf32>
    %131 = tpu.matmul %126, %21, %cst_49 {dimension_numbers = #tpu.dot_dimension_numbers<[1], [0], [0], [1], [0, 0, 1, 1], [], []>} : vector<8x32xf32>, vector<32x32xf32>, vector<8x32xf32> -> vector<8x32xf32>
    %132 = arith.addf %130, %131 : vector<8x32xf32>
    %133 = vector.extract_strided_slice %14 {offsets = [24, 0], sizes = [8, 32], strides = [1, 1]} : vector<64x32xf32> to vector<8x32xf32>
    %cst_50 = arith.constant dense<0.000000e+00> : vector<8x32xf32>
    %134 = tpu.matmul %126, %23, %cst_50 {dimension_numbers = #tpu.dot_dimension_numbers<[1], [0], [0], [1], [0, 0, 1, 1], [], []>} : vector<8x32xf32>, vector<32x32xf32>, vector<8x32xf32> -> vector<8x32xf32>
    %135 = arith.addf %133, %134 : vector<8x32xf32>
    %136 = vector.extract_strided_slice %17 {offsets = [24, 0], sizes = [8, 32], strides = [1, 1]} : vector<64x32xf32> to vector<8x32xf32>
    %cst_51 = arith.constant dense<0.000000e+00> : vector<8x32xf32>
    %137 = tpu.matmul %126, %25, %cst_51 {dimension_numbers = #tpu.dot_dimension_numbers<[1], [0], [0], [1], [0, 0, 1, 1], [], []>} : vector<8x32xf32>, vector<32x32xf32>, vector<8x32xf32> -> vector<8x32xf32>
    %138 = arith.addf %136, %137 : vector<8x32xf32>
    %139 = arith.negf %129 : vector<8x32xf32>
    %140 = math.exp %139 : vector<8x32xf32>
    %cst_52 = arith.constant 1.000000e+00 : f32
    %141 = vector.broadcast %cst_52 : f32 to vector<8x32xf32>
    %142 = arith.addf %141, %140 : vector<8x32xf32>
    %143 = arith.divf %141, %142 : vector<8x32xf32>
    %144 = arith.negf %132 : vector<8x32xf32>
    %145 = math.exp %144 : vector<8x32xf32>
    %cst_53 = arith.constant 1.000000e+00 : f32
    %146 = vector.broadcast %cst_53 : f32 to vector<8x32xf32>
    %147 = arith.addf %146, %145 : vector<8x32xf32>
    %148 = arith.divf %146, %147 : vector<8x32xf32>
    %149 = math.tanh %135 : vector<8x32xf32>
    %150 = arith.negf %138 : vector<8x32xf32>
    %151 = math.exp %150 : vector<8x32xf32>
    %cst_54 = arith.constant 1.000000e+00 : f32
    %152 = vector.broadcast %cst_54 : f32 to vector<8x32xf32>
    %153 = arith.addf %152, %151 : vector<8x32xf32>
    %154 = arith.divf %152, %153 : vector<8x32xf32>
    %155 = arith.mulf %148, %124 : vector<8x32xf32>
    %156 = arith.mulf %143, %149 : vector<8x32xf32>
    %157 = arith.addf %155, %156 : vector<8x32xf32>
    %158 = math.tanh %157 : vector<8x32xf32>
    %159 = arith.mulf %154, %158 : vector<8x32xf32>
    %160 = vector.extract_strided_slice %8 {offsets = [32, 0], sizes = [8, 32], strides = [1, 1]} : vector<64x32xf32> to vector<8x32xf32>
    %cst_55 = arith.constant dense<0.000000e+00> : vector<8x32xf32>
    %161 = tpu.matmul %159, %19, %cst_55 {dimension_numbers = #tpu.dot_dimension_numbers<[1], [0], [0], [1], [0, 0, 1, 1], [], []>} : vector<8x32xf32>, vector<32x32xf32>, vector<8x32xf32> -> vector<8x32xf32>
    %162 = arith.addf %160, %161 : vector<8x32xf32>
    %163 = vector.extract_strided_slice %11 {offsets = [32, 0], sizes = [8, 32], strides = [1, 1]} : vector<64x32xf32> to vector<8x32xf32>
    %cst_56 = arith.constant dense<0.000000e+00> : vector<8x32xf32>
    %164 = tpu.matmul %159, %21, %cst_56 {dimension_numbers = #tpu.dot_dimension_numbers<[1], [0], [0], [1], [0, 0, 1, 1], [], []>} : vector<8x32xf32>, vector<32x32xf32>, vector<8x32xf32> -> vector<8x32xf32>
    %165 = arith.addf %163, %164 : vector<8x32xf32>
    %166 = vector.extract_strided_slice %14 {offsets = [32, 0], sizes = [8, 32], strides = [1, 1]} : vector<64x32xf32> to vector<8x32xf32>
    %cst_57 = arith.constant dense<0.000000e+00> : vector<8x32xf32>
    %167 = tpu.matmul %159, %23, %cst_57 {dimension_numbers = #tpu.dot_dimension_numbers<[1], [0], [0], [1], [0, 0, 1, 1], [], []>} : vector<8x32xf32>, vector<32x32xf32>, vector<8x32xf32> -> vector<8x32xf32>
    %168 = arith.addf %166, %167 : vector<8x32xf32>
    %169 = vector.extract_strided_slice %17 {offsets = [32, 0], sizes = [8, 32], strides = [1, 1]} : vector<64x32xf32> to vector<8x32xf32>
    %cst_58 = arith.constant dense<0.000000e+00> : vector<8x32xf32>
    %170 = tpu.matmul %159, %25, %cst_58 {dimension_numbers = #tpu.dot_dimension_numbers<[1], [0], [0], [1], [0, 0, 1, 1], [], []>} : vector<8x32xf32>, vector<32x32xf32>, vector<8x32xf32> -> vector<8x32xf32>
    %171 = arith.addf %169, %170 : vector<8x32xf32>
    %172 = arith.negf %162 : vector<8x32xf32>
    %173 = math.exp %172 : vector<8x32xf32>
    %cst_59 = arith.constant 1.000000e+00 : f32
    %174 = vector.broadcast %cst_59 : f32 to vector<8x32xf32>
    %175 = arith.addf %174, %173 : vector<8x32xf32>
    %176 = arith.divf %174, %175 : vector<8x32xf32>
    %177 = arith.negf %165 : vector<8x32xf32>
    %178 = math.exp %177 : vector<8x32xf32>
    %cst_60 = arith.constant 1.000000e+00 : f32
    %179 = vector.broadcast %cst_60 : f32 to vector<8x32xf32>
    %180 = arith.addf %179, %178 : vector<8x32xf32>
    %181 = arith.divf %179, %180 : vector<8x32xf32>
    %182 = math.tanh %168 : vector<8x32xf32>
    %183 = arith.negf %171 : vector<8x32xf32>
    %184 = math.exp %183 : vector<8x32xf32>
    %cst_61 = arith.constant 1.000000e+00 : f32
    %185 = vector.broadcast %cst_61 : f32 to vector<8x32xf32>
    %186 = arith.addf %185, %184 : vector<8x32xf32>
    %187 = arith.divf %185, %186 : vector<8x32xf32>
    %188 = arith.mulf %181, %157 : vector<8x32xf32>
    %189 = arith.mulf %176, %182 : vector<8x32xf32>
    %190 = arith.addf %188, %189 : vector<8x32xf32>
    %191 = math.tanh %190 : vector<8x32xf32>
    %192 = arith.mulf %187, %191 : vector<8x32xf32>
    %193 = vector.extract_strided_slice %8 {offsets = [40, 0], sizes = [8, 32], strides = [1, 1]} : vector<64x32xf32> to vector<8x32xf32>
    %cst_62 = arith.constant dense<0.000000e+00> : vector<8x32xf32>
    %194 = tpu.matmul %192, %19, %cst_62 {dimension_numbers = #tpu.dot_dimension_numbers<[1], [0], [0], [1], [0, 0, 1, 1], [], []>} : vector<8x32xf32>, vector<32x32xf32>, vector<8x32xf32> -> vector<8x32xf32>
    %195 = arith.addf %193, %194 : vector<8x32xf32>
    %196 = vector.extract_strided_slice %11 {offsets = [40, 0], sizes = [8, 32], strides = [1, 1]} : vector<64x32xf32> to vector<8x32xf32>
    %cst_63 = arith.constant dense<0.000000e+00> : vector<8x32xf32>
    %197 = tpu.matmul %192, %21, %cst_63 {dimension_numbers = #tpu.dot_dimension_numbers<[1], [0], [0], [1], [0, 0, 1, 1], [], []>} : vector<8x32xf32>, vector<32x32xf32>, vector<8x32xf32> -> vector<8x32xf32>
    %198 = arith.addf %196, %197 : vector<8x32xf32>
    %199 = vector.extract_strided_slice %14 {offsets = [40, 0], sizes = [8, 32], strides = [1, 1]} : vector<64x32xf32> to vector<8x32xf32>
    %cst_64 = arith.constant dense<0.000000e+00> : vector<8x32xf32>
    %200 = tpu.matmul %192, %23, %cst_64 {dimension_numbers = #tpu.dot_dimension_numbers<[1], [0], [0], [1], [0, 0, 1, 1], [], []>} : vector<8x32xf32>, vector<32x32xf32>, vector<8x32xf32> -> vector<8x32xf32>
    %201 = arith.addf %199, %200 : vector<8x32xf32>
    %202 = vector.extract_strided_slice %17 {offsets = [40, 0], sizes = [8, 32], strides = [1, 1]} : vector<64x32xf32> to vector<8x32xf32>
    %cst_65 = arith.constant dense<0.000000e+00> : vector<8x32xf32>
    %203 = tpu.matmul %192, %25, %cst_65 {dimension_numbers = #tpu.dot_dimension_numbers<[1], [0], [0], [1], [0, 0, 1, 1], [], []>} : vector<8x32xf32>, vector<32x32xf32>, vector<8x32xf32> -> vector<8x32xf32>
    %204 = arith.addf %202, %203 : vector<8x32xf32>
    %205 = arith.negf %195 : vector<8x32xf32>
    %206 = math.exp %205 : vector<8x32xf32>
    %cst_66 = arith.constant 1.000000e+00 : f32
    %207 = vector.broadcast %cst_66 : f32 to vector<8x32xf32>
    %208 = arith.addf %207, %206 : vector<8x32xf32>
    %209 = arith.divf %207, %208 : vector<8x32xf32>
    %210 = arith.negf %198 : vector<8x32xf32>
    %211 = math.exp %210 : vector<8x32xf32>
    %cst_67 = arith.constant 1.000000e+00 : f32
    %212 = vector.broadcast %cst_67 : f32 to vector<8x32xf32>
    %213 = arith.addf %212, %211 : vector<8x32xf32>
    %214 = arith.divf %212, %213 : vector<8x32xf32>
    %215 = math.tanh %201 : vector<8x32xf32>
    %216 = arith.negf %204 : vector<8x32xf32>
    %217 = math.exp %216 : vector<8x32xf32>
    %cst_68 = arith.constant 1.000000e+00 : f32
    %218 = vector.broadcast %cst_68 : f32 to vector<8x32xf32>
    %219 = arith.addf %218, %217 : vector<8x32xf32>
    %220 = arith.divf %218, %219 : vector<8x32xf32>
    %221 = arith.mulf %214, %190 : vector<8x32xf32>
    %222 = arith.mulf %209, %215 : vector<8x32xf32>
    %223 = arith.addf %221, %222 : vector<8x32xf32>
    %224 = math.tanh %223 : vector<8x32xf32>
    %225 = arith.mulf %220, %224 : vector<8x32xf32>
    %226 = vector.extract_strided_slice %8 {offsets = [48, 0], sizes = [8, 32], strides = [1, 1]} : vector<64x32xf32> to vector<8x32xf32>
    %cst_69 = arith.constant dense<0.000000e+00> : vector<8x32xf32>
    %227 = tpu.matmul %225, %19, %cst_69 {dimension_numbers = #tpu.dot_dimension_numbers<[1], [0], [0], [1], [0, 0, 1, 1], [], []>} : vector<8x32xf32>, vector<32x32xf32>, vector<8x32xf32> -> vector<8x32xf32>
    %228 = arith.addf %226, %227 : vector<8x32xf32>
    %229 = vector.extract_strided_slice %11 {offsets = [48, 0], sizes = [8, 32], strides = [1, 1]} : vector<64x32xf32> to vector<8x32xf32>
    %cst_70 = arith.constant dense<0.000000e+00> : vector<8x32xf32>
    %230 = tpu.matmul %225, %21, %cst_70 {dimension_numbers = #tpu.dot_dimension_numbers<[1], [0], [0], [1], [0, 0, 1, 1], [], []>} : vector<8x32xf32>, vector<32x32xf32>, vector<8x32xf32> -> vector<8x32xf32>
    %231 = arith.addf %229, %230 : vector<8x32xf32>
    %232 = vector.extract_strided_slice %14 {offsets = [48, 0], sizes = [8, 32], strides = [1, 1]} : vector<64x32xf32> to vector<8x32xf32>
    %cst_71 = arith.constant dense<0.000000e+00> : vector<8x32xf32>
    %233 = tpu.matmul %225, %23, %cst_71 {dimension_numbers = #tpu.dot_dimension_numbers<[1], [0], [0], [1], [0, 0, 1, 1], [], []>} : vector<8x32xf32>, vector<32x32xf32>, vector<8x32xf32> -> vector<8x32xf32>
    %234 = arith.addf %232, %233 : vector<8x32xf32>
    %235 = vector.extract_strided_slice %17 {offsets = [48, 0], sizes = [8, 32], strides = [1, 1]} : vector<64x32xf32> to vector<8x32xf32>
    %cst_72 = arith.constant dense<0.000000e+00> : vector<8x32xf32>
    %236 = tpu.matmul %225, %25, %cst_72 {dimension_numbers = #tpu.dot_dimension_numbers<[1], [0], [0], [1], [0, 0, 1, 1], [], []>} : vector<8x32xf32>, vector<32x32xf32>, vector<8x32xf32> -> vector<8x32xf32>
    %237 = arith.addf %235, %236 : vector<8x32xf32>
    %238 = arith.negf %228 : vector<8x32xf32>
    %239 = math.exp %238 : vector<8x32xf32>
    %cst_73 = arith.constant 1.000000e+00 : f32
    %240 = vector.broadcast %cst_73 : f32 to vector<8x32xf32>
    %241 = arith.addf %240, %239 : vector<8x32xf32>
    %242 = arith.divf %240, %241 : vector<8x32xf32>
    %243 = arith.negf %231 : vector<8x32xf32>
    %244 = math.exp %243 : vector<8x32xf32>
    %cst_74 = arith.constant 1.000000e+00 : f32
    %245 = vector.broadcast %cst_74 : f32 to vector<8x32xf32>
    %246 = arith.addf %245, %244 : vector<8x32xf32>
    %247 = arith.divf %245, %246 : vector<8x32xf32>
    %248 = math.tanh %234 : vector<8x32xf32>
    %249 = arith.negf %237 : vector<8x32xf32>
    %250 = math.exp %249 : vector<8x32xf32>
    %cst_75 = arith.constant 1.000000e+00 : f32
    %251 = vector.broadcast %cst_75 : f32 to vector<8x32xf32>
    %252 = arith.addf %251, %250 : vector<8x32xf32>
    %253 = arith.divf %251, %252 : vector<8x32xf32>
    %254 = arith.mulf %247, %223 : vector<8x32xf32>
    %255 = arith.mulf %242, %248 : vector<8x32xf32>
    %256 = arith.addf %254, %255 : vector<8x32xf32>
    %257 = math.tanh %256 : vector<8x32xf32>
    %258 = arith.mulf %253, %257 : vector<8x32xf32>
    %259 = vector.extract_strided_slice %8 {offsets = [56, 0], sizes = [8, 32], strides = [1, 1]} : vector<64x32xf32> to vector<8x32xf32>
    %cst_76 = arith.constant dense<0.000000e+00> : vector<8x32xf32>
    %260 = tpu.matmul %258, %19, %cst_76 {dimension_numbers = #tpu.dot_dimension_numbers<[1], [0], [0], [1], [0, 0, 1, 1], [], []>} : vector<8x32xf32>, vector<32x32xf32>, vector<8x32xf32> -> vector<8x32xf32>
    %261 = arith.addf %259, %260 : vector<8x32xf32>
    %262 = vector.extract_strided_slice %11 {offsets = [56, 0], sizes = [8, 32], strides = [1, 1]} : vector<64x32xf32> to vector<8x32xf32>
    %cst_77 = arith.constant dense<0.000000e+00> : vector<8x32xf32>
    %263 = tpu.matmul %258, %21, %cst_77 {dimension_numbers = #tpu.dot_dimension_numbers<[1], [0], [0], [1], [0, 0, 1, 1], [], []>} : vector<8x32xf32>, vector<32x32xf32>, vector<8x32xf32> -> vector<8x32xf32>
    %264 = arith.addf %262, %263 : vector<8x32xf32>
    %265 = vector.extract_strided_slice %14 {offsets = [56, 0], sizes = [8, 32], strides = [1, 1]} : vector<64x32xf32> to vector<8x32xf32>
    %cst_78 = arith.constant dense<0.000000e+00> : vector<8x32xf32>
    %266 = tpu.matmul %258, %23, %cst_78 {dimension_numbers = #tpu.dot_dimension_numbers<[1], [0], [0], [1], [0, 0, 1, 1], [], []>} : vector<8x32xf32>, vector<32x32xf32>, vector<8x32xf32> -> vector<8x32xf32>
    %267 = arith.addf %265, %266 : vector<8x32xf32>
    %268 = vector.extract_strided_slice %17 {offsets = [56, 0], sizes = [8, 32], strides = [1, 1]} : vector<64x32xf32> to vector<8x32xf32>
    %cst_79 = arith.constant dense<0.000000e+00> : vector<8x32xf32>
    %269 = tpu.matmul %258, %25, %cst_79 {dimension_numbers = #tpu.dot_dimension_numbers<[1], [0], [0], [1], [0, 0, 1, 1], [], []>} : vector<8x32xf32>, vector<32x32xf32>, vector<8x32xf32> -> vector<8x32xf32>
    %270 = arith.addf %268, %269 : vector<8x32xf32>
    %271 = arith.negf %261 : vector<8x32xf32>
    %272 = math.exp %271 : vector<8x32xf32>
    %cst_80 = arith.constant 1.000000e+00 : f32
    %273 = vector.broadcast %cst_80 : f32 to vector<8x32xf32>
    %274 = arith.addf %273, %272 : vector<8x32xf32>
    %275 = arith.divf %273, %274 : vector<8x32xf32>
    %276 = arith.negf %264 : vector<8x32xf32>
    %277 = math.exp %276 : vector<8x32xf32>
    %cst_81 = arith.constant 1.000000e+00 : f32
    %278 = vector.broadcast %cst_81 : f32 to vector<8x32xf32>
    %279 = arith.addf %278, %277 : vector<8x32xf32>
    %280 = arith.divf %278, %279 : vector<8x32xf32>
    %281 = math.tanh %267 : vector<8x32xf32>
    %282 = arith.negf %270 : vector<8x32xf32>
    %283 = math.exp %282 : vector<8x32xf32>
    %cst_82 = arith.constant 1.000000e+00 : f32
    %284 = vector.broadcast %cst_82 : f32 to vector<8x32xf32>
    %285 = arith.addf %284, %283 : vector<8x32xf32>
    %286 = arith.divf %284, %285 : vector<8x32xf32>
    %287 = arith.mulf %280, %256 : vector<8x32xf32>
    %288 = arith.mulf %275, %281 : vector<8x32xf32>
    %289 = arith.addf %287, %288 : vector<8x32xf32>
    %290 = math.tanh %289 : vector<8x32xf32>
    %291 = arith.mulf %286, %290 : vector<8x32xf32>
    %c0_83 = arith.constant 0 : index
    %c0_84 = arith.constant 0 : index
    %292 = vector.load %arg3[%c0_83, %c0_84] : memref<32x128xf32, #tpu.memory_space<vmem>>, vector<32x128xf32>
    %cst_85 = arith.constant dense<0.000000e+00> : vector<8x128xf32>
    %293 = tpu.matmul %291, %292, %cst_85 {dimension_numbers = #tpu.dot_dimension_numbers<[1], [0], [0], [1], [0, 0, 1, 1], [], []>} : vector<8x32xf32>, vector<32x128xf32>, vector<8x128xf32> -> vector<8x128xf32>
    %c0_86 = arith.constant 0 : index
    %c0_87 = arith.constant 0 : index
    %294 = vector.load %arg4[%c0_86, %c0_87] : memref<1x128xf32, #tpu.memory_space<vmem>>, vector<1x128xf32>
    %295 = vector.broadcast %294 : vector<1x128xf32> to vector<8x128xf32>
    %296 = arith.addf %293, %295 : vector<8x128xf32>
    %c0_88 = arith.constant 0 : index
    %c0_89 = arith.constant 0 : index
    %297 = vector.load %arg5[%c0_88, %c0_89] : memref<8x128xf32, #tpu.memory_space<vmem>>, vector<8x128xf32>
    tpu.vector_store %arg5[%c0_88, %c0_89], %296 {strides = array<i32>} : memref<8x128xf32, #tpu.memory_space<vmem>>, vector<8x128xf32>,
    return
  }
}

</mosaic_0001>

<bundles_post_ra>
// kernel: lstm_classifier_forward.1
= control target key start
LH: loop header
LB: loop body
LE: loop exit
PB: predicated region body
PF: predicated region fallthrough
CT: control target
= control target key end

     0   :  { %v4138_v0 = vmov 0   ;;  %v28_v27 = vlaneseq  ;;  %vm86_vm0 = vcmask 523264   ;;  %v4990_v31 = vmov 0.0   ;;  %s4984_s0 = inlined_call_operand.vmem [shape: s32[64,1], index: 0, kind: input, shape index: {}]   ;;  %s4985_s1 = inlined_call_operand.vmem [shape: f32[4,64,32], index: 1, kind: input, shape index: {}]   ;;  %s4986_s2 = inlined_call_operand.vmem [shape: f32[4,32,32], index: 2, kind: input, shape index: {}]   ;;  %s4987_s3 = inlined_call_operand.vmem [shape: f32[32,128], index: 3, kind: input, shape index: {}]   ;;  %s4988_s4 = inlined_call_operand.vmem [shape: f32[1,128], index: 4, kind: input, shape index: {}]   ;;  %s4989_s5 = inlined_call_operand.vmem [shape: f32[8,128], index: 5, kind: output, shape index: {}]  }
   0x1   :  { %3993 = vset.pattern.permute.xlu1 %v4138_v0  ;;  %3992 = vset.pattern.permute.xlu0 %v4138_v0  ;;  %v22_v1 = vld [vmem:[%s4984_s0 + $0x10] sm:$0xff]  ;;  %v20_v2 = vld [vmem:[%s4984_s0] sm:$0xff]  ;;  %v23_v3 = vld [vmem:[%s4984_s0 + $0x18] sm:$0xff]  ;;  %vm4140_vm9 = vmmov 0   ;;  %vm577_vm10 = vcmask 261120  }
   0x2   :  { %37 = vperm.xlu1 %3993, %v22_v1   ;;  %31 = vperm.xlu0 %3992, %v20_v2   ;;  %v21_v4 = vld [vmem:[%s4984_s0 + $0x8] sm:$0xff]  ;;  %v85_v5 = vld [vmem:[%s4985_s1 + $0x38] sm:$0xff]  ;;  %v84_v7 = vld [vmem:[%s4985_s1 + $0x30] sm:$0xff]  ;;  %v4249_v28 = vand.u32 127, %v28_v27 }
   0x3   :  { %3514 = vmatprep.subr.mxu0 %v85_v5  ;;  %v3178_v6 = vld [vmem:[%s4985_s1 + $0x78] sm:$0xff]  ;;  %v3177_v8 = vld [vmem:[%s4985_s1 + $0x70] sm:$0xff]  ;;  %v83_v9 = vld [vmem:[%s4985_s1 + $0x28] sm:$0xff] }
   0x4   :  { %3542 = vmatprep.subr.mxu1 %v3178_v6  ;;  %3515 = vmatpush3.msra.mxu0 %v85_v5  ;;  %v25_v10 = vld [vmem:[%s4984_s0 + $0x28] sm:$0xff]  ;;  %v24_v11 = vld [vmem:[%s4984_s0 + $0x20] sm:$0xff]  ;;  %v27_v15 = vld [vmem:[%s4984_s0 + $0x38] sm:$0xff] }
   0x5   :  { %3543 = vmatpush3.msra.mxu1 %v3178_v6  ;;  %3516 = vmatprep.subr.mxu0 %v84_v7  ;;  %v3176_v12 = vld [vmem:[%s4985_s1 + $0x68] sm:$0xff]  ;;  %v82_v13 = vld [vmem:[%s4985_s1 + $0x20] sm:$0xff]  ;;  %v26_v16 = vld [vmem:[%s4984_s0 + $0x30] sm:$0xff] }
   0x6   :  { %40 = vperm.xlu1 %3993, %v23_v3   ;;  %34 = vperm.xlu0 %3992, %v21_v4   ;;  %v3175_v14 = vld [vmem:[%s4985_s1 + $0x60] sm:$0xff]  ;;  %v81_v17 = vld [vmem:[%s4985_s1 + $0x18] sm:$0xff]  ;;  %v80_v19 = vld [vmem:[%s4985_s1 + $0x10] sm:$0xff] }
   0x7   :  { %3544 = vmatprep.subr.mxu1 %v3177_v8  ;;  %3517 = vmatpush3.msra.mxu0 %v84_v7  ;;  %v3174_v18 = vld [vmem:[%s4985_s1 + $0x58] sm:$0xff]  ;;  %v3173_v20 = vld [vmem:[%s4985_s1 + $0x50] sm:$0xff]  ;;  %v79_v21 = vld [vmem:[%s4985_s1 + $0x8] sm:$0xff] }
   0x8   :  { %3545 = vmatpush3.msra.mxu1 %v3177_v8  ;;  %3518 = vmatprep.subr.mxu0 %v83_v9  ;;  %v3172_v22 = vld [vmem:[%s4985_s1 + $0x48] sm:$0xff]  ;;  %v78_v23 = vld [vmem:[%s4985_s1] sm:$0xff]  ;;  %v3194_v25 = vld [vmem:[%s4985_s1 + $0xb8] sm:$0xff] }
   0x9   :  { %3546 = vmatprep.subr.mxu1 %v3176_v12  ;;  %3519 = vmatpush3.msra.mxu0 %v83_v9  ;;  %v3171_v24 = vld [vmem:[%s4985_s1 + $0x40] sm:$0xff]  ;;  %v3210_v26 = vld [vmem:[%s4985_s1 + $0xf8] sm:$0xff]  ;;  %v3193_v37 = vld [vmem:[%s4985_s1 + $0xb0] sm:$0xff] }
   0xa   :  { %46 = vperm.xlu1 %3993, %v25_v10   ;;  %43 = vperm.xlu0 %3992, %v24_v11   ;;  %v3209_v38 = vld [vmem:[%s4985_s1 + $0xf0] sm:$0xff]  ;;  %v3192_v40 = vld [vmem:[%s4985_s1 + $0xa8] sm:$0xff]  ;;  %v3191_v46 = vld [vmem:[%s4985_s1 + $0xa0] sm:$0xff] }
   0xb   :  { %3547 = vmatpush3.msra.mxu1 %v3176_v12  ;;  %3520 = vmatprep.subr.mxu0 %v82_v13  ;;  %v3208_v41 = vld [vmem:[%s4985_s1 + $0xe8] sm:$0xff]  ;;  %v3207_v47 = vld [vmem:[%s4985_s1 + $0xe0] sm:$0xff]  ;;  %v3190_v48 = vld [vmem:[%s4985_s1 + $0x98] sm:$0xff] }
   0xc   :  { %3548 = vmatprep.subr.mxu1 %v3175_v14  ;;  %3521 = vmatpush3.msra.mxu0 %v82_v13  ;;  %v3206_v49 = vld [vmem:[%s4985_s1 + $0xd8] sm:$0xff]  ;;  %v3189_v53 = vld [vmem:[%s4985_s1 + $0x90] sm:$0xff]  ;;  %v3188_v55 = vld [vmem:[%s4985_s1 + $0x88] sm:$0xff] }
   0xd   :  { %3549 = vmatpush3.msra.mxu1 %v3175_v14  ;;  %3522 = vmatprep.subr.mxu0 %v81_v17  ;;  %v3205_v54 = vld [vmem:[%s4985_s1 + $0xd0] sm:$0xff]  ;;  %v3204_v56 = vld [vmem:[%s4985_s1 + $0xc8] sm:$0xff]  ;;  %v3187_v58 = vld [vmem:[%s4985_s1 + $0x80] sm:$0xff] }
   0xe   :  { %52 = vperm.xlu1 %3993, %v27_v15   ;;  %49 = vperm.xlu0 %3992, %v26_v16   ;;  %v3203_v59 = vld [vmem:[%s4985_s1 + $0xc0] sm:$0xff]  ;;  %v4356_v60 = vld [vmem:[%s4986_s2 + $0x18] sm:$0xff]  ;;  %v4378_v62 = vld [vmem:[%s4986_s2 + $0x10] sm:$0xff] }
   0xf   :  { %3550 = vmatprep.subr.mxu1 %v3174_v18  ;;  %3523 = vmatpush3.msra.mxu0 %v81_v17  ;;  %v4361_v61 = vld [vmem:[%s4986_s2 + $0x38] sm:$0xff]  ;;  %v4383_v63 = vld [vmem:[%s4986_s2 + $0x30] sm:$0xff]  ;;  %v4400_v0 = vld [vmem:[%s4986_s2 + $0x8] sm:$0xff] }
  0x10   :  { %3551 = vmatpush3.msra.mxu1 %v3174_v18  ;;  %3524 = vmatprep.subr.mxu0 %v80_v19  ;;  %v4405_v1 = vld [vmem:[%s4986_s2 + $0x28] sm:$0xff]  ;;  %v4420_v2 = vld [vmem:[%s4986_s2] sm:$0xff]  ;;  %v4440_v4 = vld [vmem:[%s4986_s2 + $0x58] sm:$0xff] }
  0x11   :  { %3552 = vmatprep.subr.mxu1 %v3173_v20  ;;  %3525 = vmatpush3.msra.mxu0 %v80_v19  ;;  %v4425_v3 = vld [vmem:[%s4986_s2 + $0x20] sm:$0xff]  ;;  %v4445_v5 = vld [vmem:[%s4986_s2 + $0x78] sm:$0xff]  ;;  %v4454_v6 = vld [vmem:[%s4986_s2 + $0x50] sm:$0xff] }
  0x12   :  { %3553 = vmatpush3.msra.mxu1 %v3173_v20  ;;  %3526 = vmatprep.subr.mxu0 %v79_v21  ;;  %v4459_v7 = vld [vmem:[%s4986_s2 + $0x70] sm:$0xff]  ;;  %v4468_v8 = vld [vmem:[%s4986_s2 + $0x48] sm:$0xff]  ;;  %v4482_v10 = vld [vmem:[%s4986_s2 + $0x40] sm:$0xff] }
  0x13   :  { %3554 = vmatprep.subr.mxu1 %v3172_v22  ;;  %3527 = vmatpush3.msra.mxu0 %v79_v21  ;;  %v4473_v9 = vld [vmem:[%s4986_s2 + $0x68] sm:$0xff]  ;;  %v4489_v11 = vld [vmem:[%s4986_s2 + $0x60] sm:$0xff] }
  0x14   :  { %3555 = vmatpush3.msra.mxu1 %v3172_v22  ;;  %3528 = vmatprep.subr.mxu0 %v78_v23 }
  0x15   :  { %3556 = vmatprep.subr.mxu1 %v3171_v24  ;;  %3529 = vmatpush3.msra.mxu0 %v78_v23 }
  0x16   :  { %3557 = vmatpush3.msra.mxu1 %v3171_v24  ;;  %3570 = vmatprep.subr.mxu0 %v3194_v25 }
  0x17   :  { %3598 = vmatprep.subr.mxu1 %v3210_v26 }
  0x7d   :  { %v38_v29 = vpop.permute.xlu1 %37  ;;  %v32_v30 = vpop.permute.xlu0 %31 }
  0x7e   :  { %vm54_vm1 = vcmp.eq.s32.totalorder %v4249_v28, %v32_v30  ;;  %vm56_vm2 = vcmp.eq.s32.totalorder %v4249_v28, %v38_v29 }
  0x7f   :  { %v4253_v32 = vsel %vm54_vm1, 1.0, %v4990_v31  ;;  %v4262_v34 = vsel %vm56_vm2, 1.0, %v4990_v31 }
  0x80   :  { %3530 = vmatprep.mubr.msk.f32.mxu0 %vm86_vm0, %v4253_v32  ;;  %3558 = vmatprep.mubr.msk.f32.mxu1 %vm86_vm0, %v4253_v32 }
  0x81   :  { %v35_v33 = vpop.permute.xlu0 %34  ;;  %v41_v35 = vpop.permute.xlu1 %40 }
  0x82   :  { %vm55_vm3 = vcmp.eq.s32.totalorder %v4249_v28, %v35_v33  ;;  %vm57_vm4 = vcmp.eq.s32.totalorder %v4249_v28, %v41_v35 }
  0x83   :  { %v4265_v36 = vsel %vm55_vm3, 1.0, %v4990_v31  ;;  %v4290_v42 = vsel %vm57_vm4, 1.0, %v4990_v31 }
  0x84   :  { %3531 = vmatmul.mubr.msk.f32.vlgmr.msra.gmra.mxu0 %vm86_vm0, %v4265_v36  ;;  %3559 = vmatmul.mubr.msk.f32.vlgmr.msra.gmra.mxu1 %vm86_vm0, %v4265_v36 }
  0x85   :  { %3571 = vmatpush3.msra.mxu0 %v3194_v25  ;;  %3599 = vmatpush3.msra.mxu1 %v3210_v26  ;;  %v44_v39 = vpop.permute.xlu0 %43  ;;  %v47_v43 = vpop.permute.xlu1 %46 }
  0x86   :  { %3533 = vmatprep.mubr.msk.f32.mxu0 %vm86_vm0, %v4262_v34  ;;  %3561 = vmatprep.mubr.msk.f32.mxu1 %vm86_vm0, %v4262_v34  ;;  %vm58_vm5 = vcmp.eq.s32.totalorder %v4249_v28, %v44_v39  ;;  %vm59_vm6 = vcmp.eq.s32.totalorder %v4249_v28, %v47_v43 }
  0x87   :  { %3572 = vmatprep.subr.mxu0 %v3193_v37  ;;  %3600 = vmatprep.subr.mxu1 %v3209_v38  ;;  %v4293_v44 = vsel %vm58_vm5, 1.0, %v4990_v31  ;;  %v3160_v50 = vsel %vm59_vm6, 1.0, %v4990_v31 }
  0x88   :  { %3573 = vmatpush3.msra.mxu0 %v3193_v37  ;;  %3601 = vmatpush3.msra.mxu1 %v3209_v38 }
  0x89   :  { %3574 = vmatprep.subr.mxu0 %v3192_v40  ;;  %3602 = vmatprep.subr.mxu1 %v3208_v41  ;;  %v50_v45 = vpop.permute.xlu0 %49  ;;  %v53_v51 = vpop.permute.xlu1 %52 }
  0x8a   :  { %3534 = vmatmul.mubr.msk.f32.gmra.mxu0 %vm86_vm0, %v4290_v42  ;;  %3562 = vmatmul.mubr.msk.f32.gmra.mxu1 %vm86_vm0, %v4290_v42  ;;  %vm60_vm7 = vcmp.eq.s32.totalorder %v4249_v28, %v50_v45  ;;  %vm61_vm8 = vcmp.eq.s32.totalorder %v4249_v28, %v53_v51 }
  0x8b   :  { %3575 = vmatpush3.msra.mxu0 %v3192_v40  ;;  %3603 = vmatpush3.msra.mxu1 %v3208_v41  ;;  %v4319_v52 = vsel %vm60_vm7, 1.0, %v4990_v31  ;;  %v3162_v57 = vsel %vm61_vm8, 1.0, %v4990_v31 }
  0x8c   :  { %3536 = vmatprep.mubr.msk.f32.mxu0 %vm86_vm0, %v4293_v44  ;;  %3564 = vmatprep.mubr.msk.f32.mxu1 %vm86_vm0, %v4293_v44 }
  0x8d   :  { %3576 = vmatprep.subr.mxu0 %v3191_v46  ;;  %3604 = vmatprep.subr.mxu1 %v3207_v47 }
  0x8e   :  { %3577 = vmatpush3.msra.mxu0 %v3191_v46  ;;  %3605 = vmatpush3.msra.mxu1 %v3207_v47 }
  0x8f   :  { %3578 = vmatprep.subr.mxu0 %v3190_v48  ;;  %3606 = vmatprep.subr.mxu1 %v3206_v49 }
  0x90   :  { %3537 = vmatmul.mubr.msk.f32.gmra.mxu0 %vm86_vm0, %v3160_v50  ;;  %3565 = vmatmul.mubr.msk.f32.gmra.mxu1 %vm86_vm0, %v3160_v50 }
  0x91   :  { %3579 = vmatpush3.msra.mxu0 %v3190_v48  ;;  %3607 = vmatpush3.msra.mxu1 %v3206_v49 }
  0x92   :  { %3539 = vmatprep.mubr.msk.f32.mxu0 %vm86_vm0, %v4319_v52  ;;  %3567 = vmatprep.mubr.msk.f32.mxu1 %vm86_vm0, %v4319_v52 }
  0x93   :  { %3580 = vmatprep.subr.mxu0 %v3189_v53  ;;  %3608 = vmatprep.subr.mxu1 %v3205_v54 }
  0x94   :  { %3581 = vmatpush3.msra.mxu0 %v3189_v53  ;;  %3609 = vmatpush3.msra.mxu1 %v3205_v54 }
  0x95   :  { %3582 = vmatprep.subr.mxu0 %v3188_v55  ;;  %3610 = vmatprep.subr.mxu1 %v3204_v56 }
  0x96   :  { %3540 = vmatmul.mubr.msk.f32.gmra.mxu0 %vm86_vm0, %v3162_v57  ;;  %3568 = vmatmul.mubr.msk.f32.gmra.mxu1 %vm86_vm0, %v3162_v57 }
  0x97   :  { %3583 = vmatpush3.msra.mxu0 %v3188_v55  ;;  %3611 = vmatpush3.msra.mxu1 %v3204_v56 }
  0x98   :  { %3584 = vmatprep.subr.mxu0 %v3187_v58  ;;  %3586 = vmatprep.mubr.msk.f32.mxu0 %vm86_vm0, %v4253_v32 }
  0x99   :  { %3612 = vmatprep.subr.mxu1 %v3203_v59  ;;  %3614 = vmatprep.mubr.msk.f32.mxu1 %vm86_vm0, %v4253_v32 }
  0x9a   :  { %3585 = vmatpush3.msra.mxu0 %v3187_v58  ;;  %3613 = vmatpush3.msra.mxu1 %v3203_v59 }
  0x9b   :  { %3626 = vmatprep.subr.mxu0 %v4990_v31  ;;  %3637 = vmatprep.subr.mxu1 %v4990_v31 }
  0x9c   :  { %3587 = vmatmul.mubr.msk.f32.vlgmr.msra.gmra.mxu0 %vm86_vm0, %v4265_v36  ;;  %3615 = vmatmul.mubr.msk.f32.vlgmr.msra.gmra.mxu1 %vm86_vm0, %v4265_v36 }
  0x9d   :  { %3627 = vmatpush3.msra.mxu0 %v4356_v60  ;;  %3638 = vmatpush3.msra.mxu1 %v4361_v61 }
  0x9e   :  { %3589 = vmatprep.mubr.msk.f32.mxu0 %vm86_vm0, %v4262_v34  ;;  %3617 = vmatprep.mubr.msk.f32.mxu1 %vm86_vm0, %v4262_v34 }
  0x9f   :  { %3628 = vmatprep.subr.mxu0 %v4990_v31  ;;  %3639 = vmatprep.subr.mxu1 %v4990_v31 }
  0xa0   :  { %3590 = vmatmul.mubr.msk.f32.gmra.mxu0 %vm86_vm0, %v4290_v42  ;;  %3618 = vmatmul.mubr.msk.f32.gmra.mxu1 %vm86_vm0, %v4290_v42 }
  0xa1   :  { %3629 = vmatpush3.msra.mxu0 %v4378_v62  ;;  %3640 = vmatpush3.msra.mxu1 %v4383_v63 }
  0xa2   :  { %3592 = vmatprep.mubr.msk.f32.mxu0 %vm86_vm0, %v4293_v44  ;;  %3620 = vmatprep.mubr.msk.f32.mxu1 %vm86_vm0, %v4293_v44 }
  0xa3   :  { %3630 = vmatprep.subr.mxu0 %v4990_v31  ;;  %3641 = vmatprep.subr.mxu1 %v4990_v31 }
  0xa4   :  { %3593 = vmatmul.mubr.msk.f32.gmra.mxu0 %vm86_vm0, %v3160_v50  ;;  %3621 = vmatmul.mubr.msk.f32.gmra.mxu1 %vm86_vm0, %v3160_v50 }
  0xa5   :  { %3631 = vmatpush3.msra.mxu0 %v4400_v0  ;;  %3642 = vmatpush3.msra.mxu1 %v4405_v1 }
  0xa6   :  { %3595 = vmatprep.mubr.msk.f32.mxu0 %vm86_vm0, %v4319_v52  ;;  %3623 = vmatprep.mubr.msk.f32.mxu1 %vm86_vm0, %v4319_v52 }
  0xa7   :  { %3632 = vmatprep.subr.mxu0 %v4990_v31  ;;  %3643 = vmatprep.subr.mxu1 %v4990_v31 }
  0xa8   :  { %3596 = vmatmul.mubr.msk.f32.gmra.mxu0 %vm86_vm0, %v3162_v57  ;;  %3624 = vmatmul.mubr.msk.f32.gmra.mxu1 %vm86_vm0, %v3162_v57 }
  0xa9   :  { %3633 = vmatpush3.msra.mxu0 %v4420_v2  ;;  %3644 = vmatpush3.msra.mxu1 %v4425_v3 }
  0xaa   :  { %3634 = vmatprep.mubr.msk.f32.mxu0 %vm4140_vm9, %v4990_v31  ;;  %3645 = vmatprep.mubr.msk.f32.mxu1 %vm4140_vm9, %v4990_v31 }
  0xab   :  { %3648 = vmatprep.subr.mxu0 %v4990_v31  ;;  %3659 = vmatprep.subr.mxu1 %v4990_v31 }
  0xac   :  { %3635 = vmatmul.mubr.f32.vlgmr.msra.gmra.mxu0 %v4990_v31  ;;  %3646 = vmatmul.mubr.f32.vlgmr.msra.gmra.mxu1 %v4990_v31 }
  0xad   :  { %3649 = vmatpush3.msra.mxu0 %v4440_v4  ;;  %3660 = vmatpush3.msra.mxu1 %v4445_v5 }
  0xae   :  { %3650 = vmatprep.subr.mxu0 %v4990_v31  ;;  %3661 = vmatprep.subr.mxu1 %v4990_v31 }
  0xaf   :  { %3651 = vmatpush3.msra.mxu0 %v4454_v6  ;;  %3662 = vmatpush3.msra.mxu1 %v4459_v7 }
  0xb0   :  { %3652 = vmatprep.subr.mxu0 %v4990_v31  ;;  %3663 = vmatprep.subr.mxu1 %v4990_v31 }
  0xb1   :  { %3653 = vmatpush3.msra.mxu0 %v4468_v8  ;;  %3664 = vmatpush3.msra.mxu1 %v4473_v9 }
  0xb2   :  { %3654 = vmatprep.subr.mxu0 %v4990_v31  ;;  %3665 = vmatprep.subr.mxu1 %v4990_v31 }
  0xb3   :  { %3655 = vmatpush3.msra.mxu0 %v4482_v10  ;;  %3656 = vmatprep.mubr.msk.f32.mxu0 %vm4140_vm9, %v4990_v31 }
  0xb4   :  { %3666 = vmatpush3.msra.mxu1 %v4489_v11  ;;  %3667 = vmatprep.mubr.msk.f32.mxu1 %vm4140_vm9, %v4990_v31 }
  0xb5   :  { %3657 = vmatmul.mubr.f32.vlgmr.msra.gmra.mxu0 %v4990_v31  ;;  %3668 = vmatmul.mubr.f32.vlgmr.msra.gmra.mxu1 %v4990_v31 }
  0xb6   :  { %3670 = vmatprep.subr.mxu0 %v4990_v31  ;;  %3681 = vmatprep.subr.mxu1 %v4990_v31 }
  0xb7   :  { %3671 = vmatpush3.msra.mxu0 %v4356_v60  ;;  %3682 = vmatpush3.msra.mxu1 %v4361_v61 }
  0xb8   :  { %3672 = vmatprep.subr.mxu0 %v4990_v31  ;;  %3683 = vmatprep.subr.mxu1 %v4990_v31 }
  0xb9   :  { %3673 = vmatpush3.msra.mxu0 %v4378_v62  ;;  %3684 = vmatpush3.msra.mxu1 %v4383_v63 }
  0xba   :  { %3674 = vmatprep.subr.mxu0 %v4990_v31  ;;  %3685 = vmatprep.subr.mxu1 %v4990_v31 }
  0xbb   :  { %3675 = vmatpush3.msra.mxu0 %v4400_v0  ;;  %3686 = vmatpush3.msra.mxu1 %v4405_v1 }
  0xbc   :  { %3676 = vmatprep.subr.mxu0 %v4990_v31  ;;  %3687 = vmatprep.subr.mxu1 %v4990_v31 }
  0xbd   :  { %3677 = vmatpush3.msra.mxu0 %v4420_v2  ;;  %3688 = vmatpush3.msra.mxu1 %v4425_v3 }
  0xbe   :  { %3678 = vmatprep.mubr.msk.f32.mxu0 %vm4140_vm9, %v4990_v31  ;;  %3689 = vmatprep.mubr.msk.f32.mxu1 %vm4140_vm9, %v4990_v31 }
  0xbf   :  { %3692 = vmatprep.subr.mxu0 %v4990_v31  ;;  %3703 = vmatprep.subr.mxu1 %v4990_v31 }
 0x144   :  { %v4523_v12 = vpop.f32.mrf.mxu0  ;;  %v4525_v13 = vpop.f32.mrf.mxu1 }
 0x146   :  { %v177_v14 = vpop.f32.mrf.mxu0  ;;  %v291_v15 = vpop.f32.mrf.mxu1 }
 0x14a   :  { %v4527_v16 = vpop.f32.mrf.mxu0  ;;  %v4529_v17 = vpop.f32.mrf.mxu1 }
 0x14c   :  { %v4531_v18 = vpop.f32.mrf.mxu0  ;;  %v4533_v19 = vpop.f32.mrf.mxu1 }
 0x150   :  { %v4535_v20 = vpop.f32.mrf.mxu0  ;;  %v4537_v21 = vpop.f32.mrf.mxu1 }
 0x152   :  { %v4539_v22 = vpop.f32.mrf.mxu0  ;;  %v4541_v23 = vpop.f32.mrf.mxu1 }
 0x156   :  { %v4543_v24 = vpop.f32.mrf.mxu0  ;;  %v4545_v25 = vpop.f32.mrf.mxu1 }
 0x157   :  { %4992 = vst [vmem:[#allocation2_spill] sm:$0xff] %v4545_v25 }
 0x158   :  { %v4547_v26 = vpop.f32.mrf.mxu0  ;;  %v4549_v27 = vpop.f32.mrf.mxu1 }
 0x15c   :  { %v4551_v28 = vpop.f32.mrf.mxu0  ;;  %v4553_v29 = vpop.f32.mrf.mxu1 }
 0x15e   :  { %v405_v30 = vpop.f32.mrf.mxu0  ;;  %v519_v32 = vpop.f32.mrf.mxu1 }
 0x160   :  { %v4555_v33 = vpop.f32.mrf.mxu0  ;;  %v4557_v34 = vpop.f32.mrf.mxu1 }
 0x162   :  { %v4559_v35 = vpop.f32.mrf.mxu0  ;;  %v4561_v36 = vpop.f32.mrf.mxu1 }
 0x164   :  { %v4563_v37 = vpop.f32.mrf.mxu0  ;;  %v4565_v38 = vpop.f32.mrf.mxu1 }
 0x166   :  { %v4567_v39 = vpop.f32.mrf.mxu0  ;;  %v4569_v40 = vpop.f32.mrf.mxu1 }
 0x168   :  { %v4571_v41 = vpop.f32.mrf.mxu0  ;;  %v4573_v42 = vpop.f32.mrf.mxu1 }
 0x169   :  { %4993 = vst [vmem:[#allocation3_spill] sm:$0xff] %v4571_v41  ;;  %4994 = vst [vmem:[#allocation4_spill] sm:$0xff] %v4573_v42 }
 0x16a   :  { %v4575_v43 = vpop.f32.mrf.mxu0  ;;  %v4577_v44 = vpop.f32.mrf.mxu1 }
 0x16c   :  { %v647_v45 = vpop.f32.mrf.mxu0  ;;  %v718_v46 = vpop.f32.mrf.mxu1 }
 0x16d   :  { %v651_v47 = vadd.f32 %v647_v45, %v177_v14  ;;  %v722_v48 = vadd.f32 %v718_v46, %v291_v15 }
 0x16e   :  { %v3636_v49 = vpop.f32.mrf.mxu0  ;;  %v3647_v50 = vpop.f32.mrf.mxu1 }
 0x16f   :  { %v3231_v51 = vmul.f32 -1.442695, %v651_v47  ;;  %v3232_v52 = vmul.f32 -1.442695, %v722_v48 }
 0x171   :  { %3994 = vpow2.f32 %v3231_v51 }
 0x172   :  { %3996 = vpow2.f32 %v3232_v52 }
 0x175   :  { %v789_v53 = vpop.f32.mrf.mxu0  ;;  %v860_v54 = vpop.f32.mrf.mxu1 }
 0x176   :  { %v864_v55 = vadd.f32 %v860_v54, %v519_v32  ;;  %v793_v59 = vadd.f32 %v789_v53, %v405_v30 }
 0x177   :  { %v3658_v56 = vpop.f32.mrf.mxu0  ;;  %v3669_v57 = vpop.f32.mrf.mxu1 }
 0x178   :  { %v3233_v58 = vmul.f32 -1.442695, %v864_v55 }
 0x17a   :  { %3998 = vpow2.f32 %v3233_v58 }
 0x17b   :  { %4000 = vtanh.f32 %v793_v59 }
 0x17e   :  { %v3995_v31 = vpop.eup %3994 }
 0x17f   :  { %v3997_v41 = vpop.eup %3996  ;;  %v868_v42 = vadd.f32 1.0, %v3995_v31 }
 0x180   :  { %v874_v25 = vadd.f32 1.0, %v3997_v41 }
 0x181   :  { %4002 = vrcp.f32 %v868_v42 }
 0x182   :  { %4004 = vrcp.f32 %v874_v25  ;;  %v4995_v25 = vmov 0.0  }
 0x187   :  { %v3999_v14 = vpop.eup %3998 }
 0x188   :  { %v4001_v15 = vpop.eup %4000  ;;  %v881_v48 = vadd.f32 1.0, %v3999_v14 }
 0x18a   :  { %4006 = vrcp.f32 %v881_v48 }
 0x18e   :  { %v4003_v45 = vpop.eup %4002 }
 0x18f   :  { %v4005_v46 = vpop.eup %4004  ;;  %v885_v47 = vmul.f32 %v4003_v45, %v4001_v15 }
 0x190   :  { %v884_v49 = vmul.f32 0.0, %v4005_v46 }
 0x192   :  { %v4579_v32 = vadd.f32 %v885_v47, %v884_v49 }
 0x194   :  { %4008 = vtanh.f32 %v4579_v32 }
 0x197   :  { %v4007_v30 = vpop.eup %4006 }
 0x1a1   :  { %v4009_v50 = vpop.eup %4008 }
 0x1a2   :  { %v888_v31 = vmul.f32 %v4009_v50, %v4007_v30 }
 0x1a4   :  { %3679 = vmatmul.mubr.msk.f32.vlgmr.msra.gmra.mxu0 %vm577_vm10, %v888_v31  ;;  %3690 = vmatmul.mubr.msk.f32.vlgmr.msra.gmra.mxu1 %vm577_vm10, %v888_v31 }
 0x1a5   :  { %3693 = vmatpush3.msra.mxu0 %v4440_v4  ;;  %3704 = vmatpush3.msra.mxu1 %v4445_v5 }
 0x1a6   :  { %3694 = vmatprep.subr.mxu0 %v4995_v25  ;;  %3705 = vmatprep.subr.mxu1 %v4995_v25 }
 0x1a7   :  { %3695 = vmatpush3.msra.mxu0 %v4454_v6  ;;  %3706 = vmatpush3.msra.mxu1 %v4459_v7 }
 0x1a8   :  { %3696 = vmatprep.subr.mxu0 %v4995_v25  ;;  %3707 = vmatprep.subr.mxu1 %v4995_v25 }
 0x1a9   :  { %3697 = vmatpush3.msra.mxu0 %v4468_v8  ;;  %3708 = vmatpush3.msra.mxu1 %v4473_v9 }
 0x1aa   :  { %3698 = vmatprep.subr.mxu0 %v4995_v25  ;;  %3709 = vmatprep.subr.mxu1 %v4995_v25 }
 0x1ab   :  { %3699 = vmatpush3.msra.mxu0 %v4482_v10  ;;  %3700 = vmatprep.mubr.msk.f32.mxu0 %vm4140_vm9, %v4995_v25 }
 0x1ac   :  { %3710 = vmatpush3.msra.mxu1 %v4489_v11  ;;  %3711 = vmatprep.mubr.msk.f32.mxu1 %vm4140_vm9, %v4995_v25 }
 0x1ad   :  { %3701 = vmatmul.mubr.msk.f32.vlgmr.msra.gmra.mxu0 %vm577_vm10, %v888_v31  ;;  %3712 = vmatmul.mubr.msk.f32.vlgmr.msra.gmra.mxu1 %vm577_vm10, %v888_v31 }
 0x1ae   :  { %3714 = vmatprep.subr.mxu0 %v4995_v25  ;;  %3725 = vmatprep.subr.mxu1 %v4995_v25 }
 0x1af   :  { %3715 = vmatpush3.msra.mxu0 %v4356_v60  ;;  %3726 = vmatpush3.msra.mxu1 %v4361_v61 }
 0x1b0   :  { %3716 = vmatprep.subr.mxu0 %v4995_v25  ;;  %3727 = vmatprep.subr.mxu1 %v4995_v25 }
 0x1b1   :  { %3717 = vmatpush3.msra.mxu0 %v4378_v62  ;;  %3728 = vmatpush3.msra.mxu1 %v4383_v63 }
 0x1b2   :  { %3718 = vmatprep.subr.mxu0 %v4995_v25  ;;  %3729 = vmatprep.subr.mxu1 %v4995_v25 }
 0x1b3   :  { %3719 = vmatpush3.msra.mxu0 %v4400_v0  ;;  %3730 = vmatpush3.msra.mxu1 %v4405_v1 }
 0x1b4   :  { %3720 = vmatprep.subr.mxu0 %v4995_v25  ;;  %3731 = vmatprep.subr.mxu1 %v4995_v25 }
 0x1b5   :  { %3721 = vmatpush3.msra.mxu0 %v4420_v2  ;;  %3732 = vmatpush3.msra.mxu1 %v4425_v3 }
 0x1b6   :  { %3722 = vmatprep.mubr.msk.f32.mxu0 %vm4140_vm9, %v4995_v25  ;;  %3733 = vmatprep.mubr.msk.f32.mxu1 %vm4140_vm9, %v4995_v25 }
 0x1b7   :  { %3736 = vmatprep.subr.mxu0 %v4995_v25  ;;  %3747 = vmatprep.subr.mxu1 %v4995_v25 }
 0x264   :  { %v958_v41 = vpop.f32.mrf.mxu0  ;;  %v1029_v42 = vpop.f32.mrf.mxu1 }
 0x265   :  { %v962_v51 = vadd.f32 %v4523_v12, %v958_v41  ;;  %v1033_v52 = vadd.f32 %v4525_v13, %v1029_v42 }
 0x266   :  { %v3680_v53 = vpop.f32.mrf.mxu0  ;;  %v3691_v54 = vpop.f32.mrf.mxu1 }
 0x267   :  { %v3238_v55 = vmul.f32 -1.442695, %v962_v51  ;;  %v3239_v56 = vmul.f32 -1.442695, %v1033_v52 }
 0x269   :  { %4010 = vpow2.f32 %v3238_v55 }
 0x26a   :  { %4012 = vpow2.f32 %v3239_v56 }
 0x26d   :  { %v1100_v57 = vpop.f32.mrf.mxu0  ;;  %v1171_v58 = vpop.f32.mrf.mxu1 }
 0x26e   :  { %v1175_v59 = vadd.f32 %v4553_v29, %v1171_v58  ;;  %v1104_v46 = vadd.f32 %v4551_v28, %v1100_v57 }
 0x26f   :  { %v3702_v14 = vpop.f32.mrf.mxu0  ;;  %v3713_v15 = vpop.f32.mrf.mxu1 }
 0x270   :  { %v3240_v45 = vmul.f32 -1.442695, %v1175_v59 }
 0x272   :  { %4014 = vpow2.f32 %v3240_v45 }
 0x273   :  { %4016 = vtanh.f32 %v1104_v46 }
 0x276   :  { %v4011_v47 = vpop.eup %4010 }
 0x277   :  { %v4013_v48 = vpop.eup %4012  ;;  %v1179_v12 = vadd.f32 1.0, %v4011_v47 }
 0x278   :  { %v1185_v13 = vadd.f32 1.0, %v4013_v48 }
 0x279   :  { %4018 = vrcp.f32 %v1179_v12 }
 0x27a   :  { %4020 = vrcp.f32 %v1185_v13 }
 0x27f   :  { %v4015_v49 = vpop.eup %4014 }
 0x280   :  { %v4017_v30 = vpop.eup %4016  ;;  %v1192_v42 = vadd.f32 1.0, %v4015_v49 }
 0x282   :  { %4022 = vrcp.f32 %v1192_v42 }
 0x286   :  { %v4019_v50 = vpop.eup %4018 }
 0x287   :  { %v4021_v31 = vpop.eup %4020  ;;  %v1196_v41 = vmul.f32 %v4019_v50, %v4017_v30 }
 0x288   :  { %v1195_v29 = vmul.f32 %v4021_v31, %v4579_v32 }
 0x28a   :  { %v4631_v51 = vadd.f32 %v1196_v41, %v1195_v29 }
 0x28c   :  { %4024 = vtanh.f32 %v4631_v51 }
 0x28f   :  { %v4023_v28 = vpop.eup %4022 }
 0x299   :  { %v4025_v52 = vpop.eup %4024 }
 0x29a   :  { %v1199_v53 = vmul.f32 %v4025_v52, %v4023_v28 }
 0x29c   :  { %3723 = vmatmul.mubr.msk.f32.vlgmr.msra.gmra.mxu0 %vm577_vm10, %v1199_v53  ;;  %3734 = vmatmul.mubr.msk.f32.vlgmr.msra.gmra.mxu1 %vm577_vm10, %v1199_v53 }
 0x29d   :  { %3737 = vmatpush3.msra.mxu0 %v4440_v4  ;;  %3748 = vmatpush3.msra.mxu1 %v4445_v5 }
 0x29e   :  { %3738 = vmatprep.subr.mxu0 %v4995_v25  ;;  %3749 = vmatprep.subr.mxu1 %v4995_v25 }
 0x29f   :  { %3739 = vmatpush3.msra.mxu0 %v4454_v6  ;;  %3750 = vmatpush3.msra.mxu1 %v4459_v7 }
 0x2a0   :  { %3740 = vmatprep.subr.mxu0 %v4995_v25  ;;  %3751 = vmatprep.subr.mxu1 %v4995_v25 }
 0x2a1   :  { %3741 = vmatpush3.msra.mxu0 %v4468_v8  ;;  %3752 = vmatpush3.msra.mxu1 %v4473_v9 }
 0x2a2   :  { %3742 = vmatprep.subr.mxu0 %v4995_v25  ;;  %3753 = vmatprep.subr.mxu1 %v4995_v25 }
 0x2a3   :  { %3743 = vmatpush3.msra.mxu0 %v4482_v10  ;;  %3744 = vmatprep.mubr.msk.f32.mxu0 %vm4140_vm9, %v4995_v25 }
 0x2a4   :  { %3754 = vmatpush3.msra.mxu1 %v4489_v11  ;;  %3755 = vmatprep.mubr.msk.f32.mxu1 %vm4140_vm9, %v4995_v25 }
 0x2a5   :  { %3745 = vmatmul.mubr.msk.f32.vlgmr.msra.gmra.mxu0 %vm577_vm10, %v1199_v53  ;;  %3756 = vmatmul.mubr.msk.f32.vlgmr.msra.gmra.mxu1 %vm577_vm10, %v1199_v53 }
 0x2a6   :  { %3758 = vmatprep.subr.mxu0 %v4995_v25  ;;  %3769 = vmatprep.subr.mxu1 %v4995_v25 }
 0x2a7   :  { %3759 = vmatpush3.msra.mxu0 %v4356_v60  ;;  %3770 = vmatpush3.msra.mxu1 %v4361_v61 }
 0x2a8   :  { %3760 = vmatprep.subr.mxu0 %v4995_v25  ;;  %3771 = vmatprep.subr.mxu1 %v4995_v25 }
 0x2a9   :  { %3761 = vmatpush3.msra.mxu0 %v4378_v62  ;;  %3772 = vmatpush3.msra.mxu1 %v4383_v63 }
 0x2aa   :  { %3762 = vmatprep.subr.mxu0 %v4995_v25  ;;  %3773 = vmatprep.subr.mxu1 %v4995_v25 }
 0x2ab   :  { %3763 = vmatpush3.msra.mxu0 %v4400_v0  ;;  %3774 = vmatpush3.msra.mxu1 %v4405_v1 }
 0x2ac   :  { %3764 = vmatprep.subr.mxu0 %v4995_v25  ;;  %3775 = vmatprep.subr.mxu1 %v4995_v25 }
 0x2ad   :  { %3765 = vmatpush3.msra.mxu0 %v4420_v2  ;;  %3776 = vmatpush3.msra.mxu1 %v4425_v3 }
 0x2ae   :  { %3766 = vmatprep.mubr.msk.f32.mxu0 %vm4140_vm9, %v4995_v25  ;;  %3777 = vmatprep.mubr.msk.f32.mxu1 %vm4140_vm9, %v4995_v25 }
 0x2af   :  { %3780 = vmatprep.subr.mxu0 %v4995_v25  ;;  %3791 = vmatprep.subr.mxu1 %v4995_v25 }
 0x35c   :  { %v1269_v32 = vpop.f32.mrf.mxu0  ;;  %v1340_v54 = vpop.f32.mrf.mxu1 }
 0x35d   :  { %v1273_v55 = vadd.f32 %v1269_v32, %v4531_v18  ;;  %v1344_v56 = vadd.f32 %v1340_v54, %v4533_v19 }
 0x35e   :  { %v3724_v57 = vpop.f32.mrf.mxu0  ;;  %v3735_v58 = vpop.f32.mrf.mxu1 }
 0x35f   :  { %v3245_v59 = vmul.f32 -1.442695, %v1273_v55  ;;  %v3246_v14 = vmul.f32 -1.442695, %v1344_v56 }
 0x361   :  { %4026 = vpow2.f32 %v3245_v59 }
 0x362   :  { %4028 = vpow2.f32 %v3246_v14 }
 0x365   :  { %v1411_v15 = vpop.f32.mrf.mxu0  ;;  %v1482_v45 = vpop.f32.mrf.mxu1 }
 0x366   :  { %v1486_v46 = vadd.f32 %v1482_v45, %v4561_v36  ;;  %v1415_v13 = vadd.f32 %v1411_v15, %v4559_v35 }
 0x367   :  { %v3746_v47 = vpop.f32.mrf.mxu0  ;;  %v3757_v48 = vpop.f32.mrf.mxu1 }
 0x368   :  { %v3247_v12 = vmul.f32 -1.442695, %v1486_v46 }
 0x36a   :  { %4030 = vpow2.f32 %v3247_v12 }
 0x36b   :  { %4032 = vtanh.f32 %v1415_v13 }
 0x36e   :  { %v4027_v49 = vpop.eup %4026 }
 0x36f   :  { %v4029_v30 = vpop.eup %4028  ;;  %v1490_v18 = vadd.f32 1.0, %v4027_v49 }
 0x370   :  { %v1496_v19 = vadd.f32 1.0, %v4029_v30 }
 0x371   :  { %4034 = vrcp.f32 %v1490_v18 }
 0x372   :  { %4036 = vrcp.f32 %v1496_v19 }
 0x377   :  { %v4031_v50 = vpop.eup %4030 }
 0x378   :  { %v4033_v31 = vpop.eup %4032  ;;  %v1503_v28 = vadd.f32 1.0, %v4031_v50 }
 0x37a   :  { %4038 = vrcp.f32 %v1503_v28 }
 0x37e   :  { %v4035_v41 = vpop.eup %4034 }
 0x37f   :  { %v4037_v42 = vpop.eup %4036  ;;  %v1507_v29 = vmul.f32 %v4035_v41, %v4033_v31 }
 0x380   :  { %v1506_v36 = vmul.f32 %v4037_v42, %v4631_v51 }
 0x382   :  { %v4683_v52 = vadd.f32 %v1507_v29, %v1506_v36 }
 0x384   :  { %4040 = vtanh.f32 %v4683_v52 }
 0x387   :  { %v4039_v35 = vpop.eup %4038 }
 0x391   :  { %v4041_v53 = vpop.eup %4040 }
 0x392   :  { %v1510_v32 = vmul.f32 %v4041_v53, %v4039_v35 }
 0x394   :  { %3767 = vmatmul.mubr.msk.f32.vlgmr.msra.gmra.mxu0 %vm577_vm10, %v1510_v32  ;;  %3778 = vmatmul.mubr.msk.f32.vlgmr.msra.gmra.mxu1 %vm577_vm10, %v1510_v32 }
 0x395   :  { %3781 = vmatpush3.msra.mxu0 %v4440_v4  ;;  %3792 = vmatpush3.msra.mxu1 %v4445_v5 }
 0x396   :  { %3782 = vmatprep.subr.mxu0 %v4995_v25  ;;  %3793 = vmatprep.subr.mxu1 %v4995_v25 }
 0x397   :  { %3783 = vmatpush3.msra.mxu0 %v4454_v6  ;;  %3794 = vmatpush3.msra.mxu1 %v4459_v7 }
 0x398   :  { %3784 = vmatprep.subr.mxu0 %v4995_v25  ;;  %3795 = vmatprep.subr.mxu1 %v4995_v25 }
 0x399   :  { %3785 = vmatpush3.msra.mxu0 %v4468_v8  ;;  %3796 = vmatpush3.msra.mxu1 %v4473_v9 }
 0x39a   :  { %3786 = vmatprep.subr.mxu0 %v4995_v25  ;;  %3797 = vmatprep.subr.mxu1 %v4995_v25 }
 0x39b   :  { %3787 = vmatpush3.msra.mxu0 %v4482_v10  ;;  %3788 = vmatprep.mubr.msk.f32.mxu0 %vm4140_vm9, %v4995_v25 }
 0x39c   :  { %3798 = vmatpush3.msra.mxu1 %v4489_v11  ;;  %3799 = vmatprep.mubr.msk.f32.mxu1 %vm4140_vm9, %v4995_v25 }
 0x39d   :  { %3789 = vmatmul.mubr.msk.f32.vlgmr.msra.gmra.mxu0 %vm577_vm10, %v1510_v32  ;;  %3800 = vmatmul.mubr.msk.f32.vlgmr.msra.gmra.mxu1 %vm577_vm10, %v1510_v32 }
 0x39e   :  { %3802 = vmatprep.subr.mxu0 %v4995_v25  ;;  %3813 = vmatprep.subr.mxu1 %v4995_v25 }
 0x39f   :  { %3803 = vmatpush3.msra.mxu0 %v4356_v60  ;;  %3814 = vmatpush3.msra.mxu1 %v4361_v61 }
 0x3a0   :  { %3804 = vmatprep.subr.mxu0 %v4995_v25  ;;  %3815 = vmatprep.subr.mxu1 %v4995_v25 }
 0x3a1   :  { %3805 = vmatpush3.msra.mxu0 %v4378_v62  ;;  %3816 = vmatpush3.msra.mxu1 %v4383_v63 }
 0x3a2   :  { %3806 = vmatprep.subr.mxu0 %v4995_v25  ;;  %3817 = vmatprep.subr.mxu1 %v4995_v25 }
 0x3a3   :  { %3807 = vmatpush3.msra.mxu0 %v4400_v0  ;;  %3818 = vmatpush3.msra.mxu1 %v4405_v1 }
 0x3a4   :  { %3808 = vmatprep.subr.mxu0 %v4995_v25  ;;  %3819 = vmatprep.subr.mxu1 %v4995_v25 }
 0x3a5   :  { %3809 = vmatpush3.msra.mxu0 %v4420_v2  ;;  %3820 = vmatpush3.msra.mxu1 %v4425_v3 }
 0x3a6   :  { %3810 = vmatprep.mubr.msk.f32.mxu0 %vm4140_vm9, %v4995_v25  ;;  %3821 = vmatprep.mubr.msk.f32.mxu1 %vm4140_vm9, %v4995_v25 }
 0x3a7   :  { %3824 = vmatprep.subr.mxu0 %v4995_v25  ;;  %3835 = vmatprep.subr.mxu1 %v4995_v25 }
 0x454   :  { %v1580_v51 = vpop.f32.mrf.mxu0  ;;  %v1651_v54 = vpop.f32.mrf.mxu1 }
 0x455   :  { %v1584_v55 = vadd.f32 %v4527_v16, %v1580_v51  ;;  %v1655_v56 = vadd.f32 %v4529_v17, %v1651_v54 }
 0x456   :  { %v3768_v57 = vpop.f32.mrf.mxu0  ;;  %v3779_v58 = vpop.f32.mrf.mxu1 }
 0x457   :  { %v3252_v59 = vmul.f32 -1.442695, %v1584_v55  ;;  %v3253_v14 = vmul.f32 -1.442695, %v1655_v56 }
 0x459   :  { %4042 = vpow2.f32 %v3252_v59 }
 0x45a   :  { %4044 = vpow2.f32 %v3253_v14 }
 0x45d   :  { %v1722_v15 = vpop.f32.mrf.mxu0  ;;  %v1793_v45 = vpop.f32.mrf.mxu1 }
 0x45e   :  { %v1797_v46 = vadd.f32 %v4557_v34, %v1793_v45  ;;  %v1726_v13 = vadd.f32 %v4555_v33, %v1722_v15 }
 0x45f   :  { %v3790_v47 = vpop.f32.mrf.mxu0  ;;  %v3801_v48 = vpop.f32.mrf.mxu1 }
 0x460   :  { %v3254_v12 = vmul.f32 -1.442695, %v1797_v46 }
 0x462   :  { %4046 = vpow2.f32 %v3254_v12 }
 0x463   :  { %4048 = vtanh.f32 %v1726_v13 }
 0x466   :  { %v4043_v49 = vpop.eup %4042 }
 0x467   :  { %v4045_v30 = vpop.eup %4044  ;;  %v1801_v16 = vadd.f32 1.0, %v4043_v49 }
 0x468   :  { %v1807_v17 = vadd.f32 1.0, %v4045_v30 }
 0x469   :  { %4050 = vrcp.f32 %v1801_v16 }
 0x46a   :  { %4052 = vrcp.f32 %v1807_v17 }
 0x46f   :  { %v4047_v18 = vpop.eup %4046 }
 0x470   :  { %v4049_v19 = vpop.eup %4048  ;;  %v1814_v42 = vadd.f32 1.0, %v4047_v18 }
 0x472   :  { %4054 = vrcp.f32 %v1814_v42 }
 0x476   :  { %v4051_v50 = vpop.eup %4050 }
 0x477   :  { %v4053_v31 = vpop.eup %4052  ;;  %v1818_v41 = vmul.f32 %v4051_v50, %v4049_v19 }
 0x478   :  { %v1817_v34 = vmul.f32 %v4053_v31, %v4683_v52 }
 0x47a   :  { %v4735_v29 = vadd.f32 %v1818_v41, %v1817_v34 }
 0x47c   :  { %4056 = vtanh.f32 %v4735_v29 }
 0x47f   :  { %v4055_v33 = vpop.eup %4054 }
 0x489   :  { %v4057_v28 = vpop.eup %4056 }
 0x48a   :  { %v1821_v36 = vmul.f32 %v4057_v28, %v4055_v33 }
 0x48c   :  { %3811 = vmatmul.mubr.msk.f32.vlgmr.msra.gmra.mxu0 %vm577_vm10, %v1821_v36  ;;  %3822 = vmatmul.mubr.msk.f32.vlgmr.msra.gmra.mxu1 %vm577_vm10, %v1821_v36 }
 0x48d   :  { %3825 = vmatpush3.msra.mxu0 %v4440_v4  ;;  %3836 = vmatpush3.msra.mxu1 %v4445_v5 }
 0x48e   :  { %3826 = vmatprep.subr.mxu0 %v4995_v25  ;;  %3837 = vmatprep.subr.mxu1 %v4995_v25 }
 0x48f   :  { %3827 = vmatpush3.msra.mxu0 %v4454_v6  ;;  %3838 = vmatpush3.msra.mxu1 %v4459_v7 }
 0x490   :  { %3828 = vmatprep.subr.mxu0 %v4995_v25  ;;  %3839 = vmatprep.subr.mxu1 %v4995_v25 }
 0x491   :  { %3829 = vmatpush3.msra.mxu0 %v4468_v8  ;;  %3840 = vmatpush3.msra.mxu1 %v4473_v9 }
 0x492   :  { %3830 = vmatprep.subr.mxu0 %v4995_v25  ;;  %3841 = vmatprep.subr.mxu1 %v4995_v25 }
 0x493   :  { %3831 = vmatpush3.msra.mxu0 %v4482_v10  ;;  %3832 = vmatprep.mubr.msk.f32.mxu0 %vm4140_vm9, %v4995_v25 }
 0x494   :  { %3842 = vmatpush3.msra.mxu1 %v4489_v11  ;;  %3843 = vmatprep.mubr.msk.f32.mxu1 %vm4140_vm9, %v4995_v25 }
 0x495   :  { %3833 = vmatmul.mubr.msk.f32.vlgmr.msra.gmra.mxu0 %vm577_vm10, %v1821_v36  ;;  %3844 = vmatmul.mubr.msk.f32.vlgmr.msra.gmra.mxu1 %vm577_vm10, %v1821_v36 }
 0x496   :  { %3846 = vmatprep.subr.mxu0 %v4995_v25  ;;  %3857 = vmatprep.subr.mxu1 %v4995_v25 }
 0x497   :  { %3847 = vmatpush3.msra.mxu0 %v4356_v60  ;;  %3858 = vmatpush3.msra.mxu1 %v4361_v61 }
 0x498   :  { %3848 = vmatprep.subr.mxu0 %v4995_v25  ;;  %3859 = vmatprep.subr.mxu1 %v4995_v25 }
 0x499   :  { %3849 = vmatpush3.msra.mxu0 %v4378_v62  ;;  %3860 = vmatpush3.msra.mxu1 %v4383_v63 }
 0x49a   :  { %3850 = vmatprep.subr.mxu0 %v4995_v25  ;;  %3861 = vmatprep.subr.mxu1 %v4995_v25 }
 0x49b   :  { %3851 = vmatpush3.msra.mxu0 %v4400_v0  ;;  %3862 = vmatpush3.msra.mxu1 %v4405_v1 }
 0x49c   :  { %3852 = vmatprep.subr.mxu0 %v4995_v25  ;;  %3863 = vmatprep.subr.mxu1 %v4995_v25 }
 0x49d   :  { %3853 = vmatpush3.msra.mxu0 %v4420_v2  ;;  %3864 = vmatpush3.msra.mxu1 %v4425_v3 }
 0x49e   :  { %3854 = vmatprep.mubr.msk.f32.mxu0 %vm4140_vm9, %v4995_v25  ;;  %3865 = vmatprep.mubr.msk.f32.mxu1 %vm4140_vm9, %v4995_v25 }
 0x49f   :  { %3868 = vmatprep.subr.mxu0 %v4995_v25  ;;  %3879 = vmatprep.subr.mxu1 %v4995_v25 }
 0x54c   :  { %v1891_v52 = vpop.f32.mrf.mxu0  ;;  %v1962_v35 = vpop.f32.mrf.mxu1 }
 0x54d   :  { %v1895_v53 = vadd.f32 %v1891_v52, %v4539_v22  ;;  %v1966_v32 = vadd.f32 %v1962_v35, %v4541_v23 }
 0x54e   :  { %v3812_v51 = vpop.f32.mrf.mxu0  ;;  %v3823_v54 = vpop.f32.mrf.mxu1 }
 0x54f   :  { %v3259_v55 = vmul.f32 -1.442695, %v1895_v53  ;;  %v3260_v56 = vmul.f32 -1.442695, %v1966_v32 }
 0x551   :  { %4058 = vpow2.f32 %v3259_v55 }
 0x552   :  { %4060 = vpow2.f32 %v3260_v56 }
 0x555   :  { %v2033_v57 = vpop.f32.mrf.mxu0  ;;  %v2104_v58 = vpop.f32.mrf.mxu1 }
 0x556   :  { %v2108_v59 = vadd.f32 %v2104_v58, %v4569_v40  ;;  %v2037_v46 = vadd.f32 %v2033_v57, %v4567_v39  ;;  %v4847_v57 = vld [vmem:[%s4986_s2 + $0x58] sm:$0xff] }
 0x557   :  { %v3834_v14 = vpop.f32.mrf.mxu0  ;;  %v3845_v15 = vpop.f32.mrf.mxu1  ;;  %v4853_v58 = vld [vmem:[%s4986_s2 + $0x78] sm:$0xff] }
 0x558   :  { %v3261_v45 = vmul.f32 -1.442695, %v2108_v59  ;;  %v4130_v59 = vld [vmem:[%s4986_s2] sm:$0xff] }
 0x559   :  { %v4131_v14 = vld [vmem:[%s4986_s2 + $0x20] sm:$0xff] }
 0x55a   :  { %4062 = vpow2.f32 %v3261_v45 }
 0x55b   :  { %4064 = vtanh.f32 %v2037_v46 }
 0x55e   :  { %v4059_v47 = vpop.eup %4058 }
 0x55f   :  { %v4061_v48 = vpop.eup %4060  ;;  %v2112_v22 = vadd.f32 1.0, %v4059_v47 }
 0x560   :  { %v2118_v23 = vadd.f32 1.0, %v4061_v48 }
 0x561   :  { %4066 = vrcp.f32 %v2112_v22 }
 0x562   :  { %4068 = vrcp.f32 %v2118_v23 }
 0x567   :  { %v4063_v12 = vpop.eup %4062 }
 0x568   :  { %v4065_v13 = vpop.eup %4064  ;;  %v2125_v17 = vadd.f32 1.0, %v4063_v12 }
 0x56a   :  { %4070 = vrcp.f32 %v2125_v17 }
 0x56e   :  { %v4067_v49 = vpop.eup %4066 }
 0x56f   :  { %v4069_v30 = vpop.eup %4068  ;;  %v2129_v16 = vmul.f32 %v4067_v49, %v4065_v13 }
 0x570   :  { %v2128_v40 = vmul.f32 %v4069_v30, %v4735_v29 }
 0x572   :  { %v4787_v18 = vadd.f32 %v2129_v16, %v2128_v40 }
 0x574   :  { %4072 = vtanh.f32 %v4787_v18 }
 0x577   :  { %v4071_v39 = vpop.eup %4070 }
 0x581   :  { %v4073_v19 = vpop.eup %4072 }
 0x582   :  { %v2132_v50 = vmul.f32 %v4073_v19, %v4071_v39 }
 0x584   :  { %3855 = vmatmul.mubr.msk.f32.vlgmr.msra.gmra.mxu0 %vm577_vm10, %v2132_v50  ;;  %3866 = vmatmul.mubr.msk.f32.vlgmr.msra.gmra.mxu1 %vm577_vm10, %v2132_v50 }
 0x585   :  { %3869 = vmatpush3.msra.mxu0 %v4440_v4  ;;  %3880 = vmatpush3.msra.mxu1 %v4445_v5 }
 0x586   :  { %3870 = vmatprep.subr.mxu0 %v4995_v25  ;;  %3881 = vmatprep.subr.mxu1 %v4995_v25 }
 0x587   :  { %3871 = vmatpush3.msra.mxu0 %v4454_v6  ;;  %3882 = vmatpush3.msra.mxu1 %v4459_v7 }
 0x588   :  { %3872 = vmatprep.subr.mxu0 %v4995_v25  ;;  %3883 = vmatprep.subr.mxu1 %v4995_v25 }
 0x589   :  { %3873 = vmatpush3.msra.mxu0 %v4468_v8  ;;  %3884 = vmatpush3.msra.mxu1 %v4473_v9 }
 0x58a   :  { %3874 = vmatprep.subr.mxu0 %v4995_v25  ;;  %3885 = vmatprep.subr.mxu1 %v4995_v25 }
 0x58b   :  { %3875 = vmatpush3.msra.mxu0 %v4482_v10  ;;  %3876 = vmatprep.mubr.msk.f32.mxu0 %vm4140_vm9, %v4995_v25 }
 0x58c   :  { %3886 = vmatpush3.msra.mxu1 %v4489_v11  ;;  %3887 = vmatprep.mubr.msk.f32.mxu1 %vm4140_vm9, %v4995_v25 }
 0x58d   :  { %3877 = vmatmul.mubr.msk.f32.vlgmr.msra.gmra.mxu0 %vm577_vm10, %v2132_v50  ;;  %3888 = vmatmul.mubr.msk.f32.vlgmr.msra.gmra.mxu1 %vm577_vm10, %v2132_v50 }
 0x58e   :  { %3890 = vmatprep.subr.mxu0 %v4995_v25  ;;  %3901 = vmatprep.subr.mxu1 %v4995_v25 }
 0x58f   :  { %3891 = vmatpush3.msra.mxu0 %v4356_v60  ;;  %3902 = vmatpush3.msra.mxu1 %v4361_v61 }
 0x590   :  { %3892 = vmatprep.subr.mxu0 %v4995_v25  ;;  %3903 = vmatprep.subr.mxu1 %v4995_v25 }
 0x591   :  { %3893 = vmatpush3.msra.mxu0 %v4378_v62  ;;  %3904 = vmatpush3.msra.mxu1 %v4383_v63 }
 0x592   :  { %3894 = vmatprep.subr.mxu0 %v4995_v25  ;;  %3905 = vmatprep.subr.mxu1 %v4995_v25 }
 0x593   :  { %3895 = vmatpush3.msra.mxu0 %v4400_v0  ;;  %3906 = vmatpush3.msra.mxu1 %v4405_v1 }
 0x594   :  { %3896 = vmatprep.subr.mxu0 %v4995_v25  ;;  %3907 = vmatprep.subr.mxu1 %v4995_v25 }
 0x595   :  { %3897 = vmatpush3.msra.mxu0 %v4420_v2  ;;  %3908 = vmatpush3.msra.mxu1 %v4425_v3 }
 0x596   :  { %3898 = vmatprep.mubr.msk.f32.mxu0 %vm4140_vm9, %v4995_v25  ;;  %3909 = vmatprep.mubr.msk.f32.mxu1 %vm4140_vm9, %v4995_v25 }
 0x597   :  { %3912 = vmatprep.subr.mxu0 %v4995_v25  ;;  %3923 = vmatprep.subr.mxu1 %v4995_v25 }
 0x644   :  { %v2202_v60 = vpop.f32.mrf.mxu0  ;;  %v2273_v61 = vpop.f32.mrf.mxu1 }
 0x645   :  { %v2206_v62 = vadd.f32 %v4535_v20, %v2202_v60  ;;  %v2277_v63 = vadd.f32 %v4537_v21, %v2273_v61 }
 0x646   :  { %v3856_v0 = vpop.f32.mrf.mxu0  ;;  %v3867_v1 = vpop.f32.mrf.mxu1 }
 0x647   :  { %v3266_v2 = vmul.f32 -1.442695, %v2206_v62  ;;  %v3267_v3 = vmul.f32 -1.442695, %v2277_v63 }
 0x649   :  { %4074 = vpow2.f32 %v3266_v2 }
 0x64a   :  { %4076 = vpow2.f32 %v3267_v3 }
 0x64d   :  { %v2344_v4 = vpop.f32.mrf.mxu0  ;;  %v2415_v5 = vpop.f32.mrf.mxu1 }
 0x64e   :  { %v2419_v31 = vadd.f32 %v4565_v38, %v2415_v5  ;;  %v2348_v29 = vadd.f32 %v4563_v37, %v2344_v4  ;;  %v4132_v4 = vld [vmem:[%s4986_s2 + $0x50] sm:$0xff] }
 0x64f   :  { %v3878_v41 = vpop.f32.mrf.mxu0  ;;  %v3889_v42 = vpop.f32.mrf.mxu1  ;;  %v4133_v5 = vld [vmem:[%s4986_s2 + $0x70] sm:$0xff] }
 0x650   :  { %v3268_v34 = vmul.f32 -1.442695, %v2419_v31  ;;  %v4134_v31 = vld [vmem:[%s4986_s2 + $0x48] sm:$0xff]  ;;  %v4136_v42 = vld [vmem:[%s4986_s2 + $0x40] sm:$0xff] }
 0x651   :  { %v4135_v41 = vld [vmem:[%s4986_s2 + $0x68] sm:$0xff] }
 0x652   :  { %4078 = vpow2.f32 %v3268_v34  ;;  %v4137_v34 = vld [vmem:[%s4986_s2 + $0x60] sm:$0xff] }
 0x653   :  { %4080 = vtanh.f32 %v2348_v29  ;;  %v3069_v29 = vld [vmem:[%s4987_s3 + $0x18] sm:$0xff] }
 0x656   :  { %v4075_v33 = vpop.eup %4074 }
 0x657   :  { %v4077_v28 = vpop.eup %4076  ;;  %v2423_v20 = vadd.f32 1.0, %v4075_v33  ;;  %v3068_v33 = vld [vmem:[%s4987_s3 + $0x10] sm:$0xff] }
 0x658   :  { %v2429_v21 = vadd.f32 1.0, %v4077_v28  ;;  %v3067_v28 = vld [vmem:[%s4987_s3 + $0x8] sm:$0xff] }
 0x659   :  { %4082 = vrcp.f32 %v2423_v20  ;;  %v3066_v20 = vld [vmem:[%s4987_s3] sm:$0xff] }
 0x65a   :  { %4084 = vrcp.f32 %v2429_v21 }
 0x65f   :  { %v4079_v36 = vpop.eup %4078 }
 0x660   :  { %v4081_v52 = vpop.eup %4080  ;;  %v2436_v51 = vadd.f32 1.0, %v4079_v36 }
 0x662   :  { %4086 = vrcp.f32 %v2436_v51 }
 0x666   :  { %v4083_v35 = vpop.eup %4082 }
 0x667   :  { %v4085_v53 = vpop.eup %4084  ;;  %v2440_v32 = vmul.f32 %v4083_v35, %v4081_v52  ;;  %v4996_v35 = vld [vmem:[#allocation2_spill] sm:$0xff] }
 0x668   :  { %v2439_v38 = vmul.f32 %v4085_v53, %v4787_v18 }
 0x66a   :  { %v4839_v54 = vadd.f32 %v2440_v32, %v2439_v38 }
 0x66c   :  { %4088 = vtanh.f32 %v4839_v54 }
 0x66f   :  { %v4087_v37 = vpop.eup %4086 }
 0x679   :  { %v4089_v55 = vpop.eup %4088 }
 0x67a   :  { %v2443_v56 = vmul.f32 %v4089_v55, %v4087_v37 }
 0x67c   :  { %3899 = vmatmul.mubr.msk.f32.vlgmr.msra.gmra.mxu0 %vm577_vm10, %v2443_v56  ;;  %3910 = vmatmul.mubr.msk.f32.vlgmr.msra.gmra.mxu1 %vm577_vm10, %v2443_v56 }
 0x67d   :  { %3913 = vmatpush3.msra.mxu0 %v4847_v57  ;;  %3924 = vmatpush3.msra.mxu1 %v4853_v58 }
 0x67e   :  { %3914 = vmatprep.subr.mxu0 %v4995_v25  ;;  %3925 = vmatprep.subr.mxu1 %v4995_v25 }
 0x67f   :  { %3915 = vmatpush3.msra.mxu0 %v4454_v6  ;;  %3926 = vmatpush3.msra.mxu1 %v4459_v7  ;;  %v4124_v6 = vld [vmem:[%s4986_s2 + $0x18] sm:$0xff] }
 0x680   :  { %3916 = vmatprep.subr.mxu0 %v4995_v25  ;;  %3927 = vmatprep.subr.mxu1 %v4995_v25  ;;  %v4125_v7 = vld [vmem:[%s4986_s2 + $0x38] sm:$0xff] }
 0x681   :  { %3917 = vmatpush3.msra.mxu0 %v4468_v8  ;;  %3928 = vmatpush3.msra.mxu1 %v4473_v9  ;;  %v4126_v8 = vld [vmem:[%s4986_s2 + $0x10] sm:$0xff] }
 0x682   :  { %3918 = vmatprep.subr.mxu0 %v4995_v25  ;;  %3929 = vmatprep.subr.mxu1 %v4995_v25  ;;  %v4127_v9 = vld [vmem:[%s4986_s2 + $0x30] sm:$0xff] }
 0x683   :  { %3919 = vmatpush3.msra.mxu0 %v4482_v10  ;;  %3920 = vmatprep.mubr.msk.f32.mxu0 %vm4140_vm9, %v4995_v25  ;;  %v4128_v10 = vld [vmem:[%s4986_s2 + $0x8] sm:$0xff] }
 0x684   :  { %3930 = vmatpush3.msra.mxu1 %v4489_v11  ;;  %3931 = vmatprep.mubr.msk.f32.mxu1 %vm4140_vm9, %v4995_v25  ;;  %v4129_v11 = vld [vmem:[%s4986_s2 + $0x28] sm:$0xff] }
 0x685   :  { %3921 = vmatmul.mubr.msk.f32.vlgmr.msra.gmra.mxu0 %vm577_vm10, %v2443_v56  ;;  %3932 = vmatmul.mubr.msk.f32.vlgmr.msra.gmra.mxu1 %vm577_vm10, %v2443_v56  ;;  %v4997_v56 = vld [vmem:[#allocation4_spill] sm:$0xff] }
 0x686   :  { %3934 = vmatprep.subr.mxu0 %v4995_v25  ;;  %3945 = vmatprep.subr.mxu1 %v4995_v25 }
 0x687   :  { %3935 = vmatpush3.msra.mxu0 %v4124_v6  ;;  %3946 = vmatpush3.msra.mxu1 %v4125_v7  ;;  %v4998_v7 = vld [vmem:[#allocation3_spill] sm:$0xff] }
 0x688   :  { %3936 = vmatprep.subr.mxu0 %v4995_v25  ;;  %3947 = vmatprep.subr.mxu1 %v4995_v25 }
 0x689   :  { %3937 = vmatpush3.msra.mxu0 %v4126_v8  ;;  %3948 = vmatpush3.msra.mxu1 %v4127_v9 }
 0x68a   :  { %3938 = vmatprep.subr.mxu0 %v4995_v25  ;;  %3949 = vmatprep.subr.mxu1 %v4995_v25 }
 0x68b   :  { %3939 = vmatpush3.msra.mxu0 %v4128_v10  ;;  %3950 = vmatpush3.msra.mxu1 %v4129_v11 }
 0x68c   :  { %3940 = vmatprep.subr.mxu0 %v4995_v25  ;;  %3951 = vmatprep.subr.mxu1 %v4995_v25 }
 0x68d   :  { %3941 = vmatpush3.msra.mxu0 %v4130_v59  ;;  %3952 = vmatpush3.msra.mxu1 %v4131_v14 }
 0x68e   :  { %3942 = vmatprep.mubr.msk.f32.mxu0 %vm4140_vm9, %v4995_v25  ;;  %3953 = vmatprep.mubr.msk.f32.mxu1 %vm4140_vm9, %v4995_v25 }
 0x68f   :  { %3956 = vmatprep.subr.mxu0 %v4995_v25  ;;  %3967 = vmatprep.subr.mxu1 %v4995_v25 }
 0x73c   :  { %v2513_v15 = vpop.f32.mrf.mxu0  ;;  %v2584_v45 = vpop.f32.mrf.mxu1 }
 0x73d   :  { %v2517_v46 = vadd.f32 %v2513_v15, %v4547_v26  ;;  %v2588_v47 = vadd.f32 %v2584_v45, %v4549_v27 }
 0x73e   :  { %v3900_v48 = vpop.f32.mrf.mxu0  ;;  %v3911_v22 = vpop.f32.mrf.mxu1 }
 0x73f   :  { %v3273_v23 = vmul.f32 -1.442695, %v2517_v46  ;;  %v3274_v12 = vmul.f32 -1.442695, %v2588_v47 }
 0x741   :  { %4090 = vpow2.f32 %v3273_v23 }
 0x742   :  { %4092 = vpow2.f32 %v3274_v12 }
 0x745   :  { %v2655_v13 = vpop.f32.mrf.mxu0  ;;  %v2726_v49 = vpop.f32.mrf.mxu1 }
 0x746   :  { %v2730_v30 = vadd.f32 %v2726_v49, %v4577_v44  ;;  %v2659_v18 = vadd.f32 %v2655_v13, %v4575_v43  ;;  %v3283_v49 = vld [vmem:[%s4988_s4] ss:$0 sm:$0xff] }
 0x747   :  { %v3922_v16 = vpop.f32.mrf.mxu0  ;;  %v3933_v17 = vpop.f32.mrf.mxu1 }
 0x748   :  { %v3275_v40 = vmul.f32 -1.442695, %v2730_v30 }
 0x74a   :  { %4094 = vpow2.f32 %v3275_v40 }
 0x74b   :  { %4096 = vtanh.f32 %v2659_v18 }
 0x74e   :  { %v4091_v39 = vpop.eup %4090 }
 0x74f   :  { %v4093_v19 = vpop.eup %4092  ;;  %v2734_v26 = vadd.f32 1.0, %v4091_v39 }
 0x750   :  { %v2740_v27 = vadd.f32 1.0, %v4093_v19 }
 0x751   :  { %4098 = vrcp.f32 %v2734_v26 }
 0x752   :  { %4100 = vrcp.f32 %v2740_v27 }
 0x757   :  { %v4095_v50 = vpop.eup %4094 }
 0x758   :  { %v4097_v60 = vpop.eup %4096  ;;  %v2747_v0 = vadd.f32 1.0, %v4095_v50 }
 0x75a   :  { %4102 = vrcp.f32 %v2747_v0 }
 0x75e   :  { %v4099_v61 = vpop.eup %4098 }
 0x75f   :  { %v4101_v62 = vpop.eup %4100  ;;  %v2751_v63 = vmul.f32 %v4099_v61, %v4097_v60 }
 0x760   :  { %v2750_v44 = vmul.f32 %v4101_v62, %v4839_v54 }
 0x762   :  { %v4917_v1 = vadd.f32 %v2751_v63, %v2750_v44 }
 0x764   :  { %4104 = vtanh.f32 %v4917_v1 }
 0x767   :  { %v4103_v43 = vpop.eup %4102 }
 0x771   :  { %v4105_v2 = vpop.eup %4104 }
 0x772   :  { %v2754_v3 = vmul.f32 %v4105_v2, %v4103_v43 }
 0x774   :  { %3943 = vmatmul.mubr.msk.f32.vlgmr.msra.gmra.mxu0 %vm577_vm10, %v2754_v3  ;;  %3954 = vmatmul.mubr.msk.f32.vlgmr.msra.gmra.mxu1 %vm577_vm10, %v2754_v3 }
 0x775   :  { %3957 = vmatpush3.msra.mxu0 %v4847_v57  ;;  %3968 = vmatpush3.msra.mxu1 %v4853_v58 }
 0x776   :  { %3958 = vmatprep.subr.mxu0 %v4995_v25  ;;  %3969 = vmatprep.subr.mxu1 %v4995_v25 }
 0x777   :  { %3959 = vmatpush3.msra.mxu0 %v4132_v4  ;;  %3970 = vmatpush3.msra.mxu1 %v4133_v5 }
 0x778   :  { %3960 = vmatprep.subr.mxu0 %v4995_v25  ;;  %3971 = vmatprep.subr.mxu1 %v4995_v25 }
 0x779   :  { %3961 = vmatpush3.msra.mxu0 %v4134_v31  ;;  %3972 = vmatpush3.msra.mxu1 %v4135_v41 }
 0x77a   :  { %3962 = vmatprep.subr.mxu0 %v4995_v25  ;;  %3973 = vmatprep.subr.mxu1 %v4995_v25 }
 0x77b   :  { %3963 = vmatpush3.msra.mxu0 %v4136_v42  ;;  %3964 = vmatprep.mubr.msk.f32.mxu0 %vm4140_vm9, %v4995_v25 }
 0x77c   :  { %3974 = vmatpush3.msra.mxu1 %v4137_v34  ;;  %3975 = vmatprep.mubr.msk.f32.mxu1 %vm4140_vm9, %v4995_v25 }
 0x77d   :  { %3965 = vmatmul.mubr.msk.f32.vlgmr.msra.gmra.mxu0 %vm577_vm10, %v2754_v3  ;;  %3976 = vmatmul.mubr.msk.f32.vlgmr.msra.gmra.mxu1 %vm577_vm10, %v2754_v3 }
 0x77e   :  { %3978 = vmatprep.subr.mxu0 %v4995_v25  ;;  %3986 = vmatprep.mubr.msk.f32.mxu0 %vm4140_vm9, %v4995_v25 }
 0x77f   :  { %3979 = vmatpush3.msra.mxu0 %v3069_v29 }
 0x780   :  { %3980 = vmatprep.subr.mxu0 %v4995_v25 }
 0x781   :  { %3981 = vmatpush3.msra.mxu0 %v3068_v33 }
 0x782   :  { %3982 = vmatprep.subr.mxu0 %v4995_v25 }
 0x783   :  { %3983 = vmatpush3.msra.mxu0 %v3067_v28 }
 0x784   :  { %3984 = vmatprep.subr.mxu0 %v4995_v25 }
 0x785   :  { %3985 = vmatpush3.msra.mxu0 %v3066_v20 }
 0x834   :  { %v2824_v21 = vpop.f32.mrf.mxu0  ;;  %v2895_v36 = vpop.f32.mrf.mxu1 }
 0x835   :  { %v2828_v52 = vadd.f32 %v4543_v24, %v2824_v21  ;;  %v2899_v53 = vadd.f32 %v4996_v35, %v2895_v36 }
 0x836   :  { %v3944_v32 = vpop.f32.mrf.mxu0  ;;  %v3955_v51 = vpop.f32.mrf.mxu1 }
 0x837   :  { %v3280_v38 = vmul.f32 -1.442695, %v2828_v52  ;;  %v3281_v54 = vmul.f32 -1.442695, %v2899_v53 }
 0x839   :  { %4106 = vpow2.f32 %v3280_v38 }
 0x83a   :  { %4108 = vpow2.f32 %v3281_v54 }
 0x83d   :  { %v2966_v37 = vpop.f32.mrf.mxu0  ;;  %v3037_v55 = vpop.f32.mrf.mxu1 }
 0x83e   :  { %v3041_v57 = vadd.f32 %v4997_v56, %v3037_v55  ;;  %v2970_v8 = vadd.f32 %v4998_v7, %v2966_v37 }
 0x83f   :  { %v3966_v58 = vpop.f32.mrf.mxu0  ;;  %v3977_v6 = vpop.f32.mrf.mxu1 }
 0x840   :  { %v3282_v25 = vmul.f32 -1.442695, %v3041_v57 }
 0x842   :  { %4110 = vpow2.f32 %v3282_v25 }
 0x843   :  { %4112 = vtanh.f32 %v2970_v8 }
 0x846   :  { %v4107_v9 = vpop.eup %4106 }
 0x847   :  { %v4109_v10 = vpop.eup %4108  ;;  %v3045_v24 = vadd.f32 1.0, %v4107_v9 }
 0x848   :  { %v3051_v11 = vadd.f32 1.0, %v4109_v10 }
 0x849   :  { %4114 = vrcp.f32 %v3045_v24 }
 0x84a   :  { %4116 = vrcp.f32 %v3051_v11 }
 0x84f   :  { %v4111_v59 = vpop.eup %4110 }
 0x850   :  { %v4113_v14 = vpop.eup %4112  ;;  %v3058_v47 = vadd.f32 1.0, %v4111_v59 }
 0x852   :  { %4118 = vrcp.f32 %v3058_v47 }
 0x856   :  { %v4115_v15 = vpop.eup %4114 }
 0x857   :  { %v4117_v45 = vpop.eup %4116  ;;  %v3062_v46 = vmul.f32 %v4115_v15, %v4113_v14 }
 0x858   :  { %v3061_v48 = vmul.f32 %v4117_v45, %v4917_v1 }
 0x85a   :  { %v3063_v22 = vadd.f32 %v3062_v46, %v3061_v48 }
 0x85c   :  { %4120 = vtanh.f32 %v3063_v22 }
 0x85f   :  { %v4119_v23 = vpop.eup %4118 }
 0x869   :  { %v4121_v12 = vpop.eup %4120 }
 0x86a   :  { %v3065_v13 = vmul.f32 %v4121_v12, %v4119_v23 }
 0x86c   :  { %3987 = vmatmul.mubr.msk.f32.vlgmr.msra.gmra.mxu0 %vm577_vm10, %v3065_v13 }
 0x92c   :  { %v3146_v30 = vpop.f32.mrf.mxu0 }
 0x92d   :  { %v3147_v16 = vadd.f32 %v3283_v49, %v3146_v30 }
 0x92e   :  { %v3988_v17 = vpop.f32.mrf.mxu0 }
 0x92f   :  { %3150 = vst [vmem:[%s4989_s5] sm:$0xff] %v3147_v16 }

</bundles_post_ra>
